<compile_context>
chip_gen: v6e
topology: v6e:2x2x1
jax: 0.10.0
libtpu: 0.0.40
codegen_flags: <defaults>
</compile_context>

<pallas_src>
import functools

import jax
import jax.numpy as jnp
from jax.experimental import pallas as pl
from jax.experimental.pallas import tpu as pltpu


# --------------------------------------------------------------------------- #
# Kernel                                                                      #
# --------------------------------------------------------------------------- #
def _linear_model_kernel(x_ref, w_in_ref, s_in_ref, w_stg_ref, s_stg_ref,
                         w_out_ref, b_out_ref, o_ref, *, num_stage):
    """One batch tile: input proj + num_stage residual blocks + output proj."""
    w_in = w_in_ref[...]
    cdt = w_in.dtype                      # matmul dtype (bf16 by default, f32 optional)

    # ---- input projection + folded BN + ReLU (f32 accumulation) ------------
    x = x_ref[...].astype(cdt)                                   # (tm, in_pad)
    y = jnp.dot(x, w_in, preferred_element_type=jnp.float32)
    y = jnp.maximum(y + s_in_ref[...], 0.0)                      # f32 residual stream
    y_c = y.astype(cdt)                                          # single cast per reuse

    # ---- residual stages (statically unrolled, num_stage is small) ---------
    for s in range(num_stage):
        t = jnp.dot(y_c, w_stg_ref[2 * s], preferred_element_type=jnp.float32)
        t = jnp.maximum(t + s_stg_ref[2 * s:2 * s + 1, :], 0.0).astype(cdt)
        t = jnp.dot(t, w_stg_ref[2 * s + 1], preferred_element_type=jnp.float32)
        t = jnp.maximum(t + s_stg_ref[2 * s + 1:2 * s + 2, :], 0.0)
        y = y + t                                                # f32 residual add
        y_c = y.astype(cdt)

    # ---- output projection (no BN / ReLU on the final layer) ---------------
    o = jnp.dot(y_c, w_out_ref[...], preferred_element_type=jnp.float32)
    o_ref[...] = (o + b_out_ref[...]).astype(o_ref.dtype)


# --------------------------------------------------------------------------- #
# Wrapper helpers                                                             #
# --------------------------------------------------------------------------- #
_MIB = 1024 * 1024


def _round_up(x, m):
    return ((x + m - 1) // m) * m


def _pad_axis(a, axis, target):
    pad = target - a.shape[axis]
    if pad == 0:
        return a
    widths = [(0, 0)] * a.ndim
    widths[axis] = (0, pad)
    return jnp.pad(a, widths)


@functools.lru_cache(maxsize=1)
def _tpu_hints():
    """Best-effort hardware query (VMEM per core, multi-TensorCore chip)."""
    vmem = 64 * _MIB          # conservative fallback (v7x-sized)
    multi_tc = False
    try:
        info = pltpu.get_tpu_info()
        vmem = int(info.vmem_capacity_bytes)
        multi_tc = int(getattr(info, "num_cores", 1)) > 1
    except Exception:
        pass
    # v7x is the only 64 MiB-per-TC part and ships 2 TensorCores per chip.
    multi_tc = multi_tc or vmem <= 64 * _MIB
    return vmem, multi_tc


def _pick_tm(n8, multi_tc):
    """Batch tile: keep MXU M large and pipeline steps few.
    On 2-TC parts (v7x) use an even step count only when each tile keeps
    >= 256 rows; on single-TC parts (v5e/v6e) use one big tile up to 512/1024."""
    if multi_tc and n8 >= 512:
        steps = 2 * pl.cdiv(n8, 1024)
    else:
        cap = 1024 if n8 >= 2048 else 512
        steps = pl.cdiv(n8, cap)
    return _round_up(pl.cdiv(n8, steps), 8)


def _vmem_limit_bytes(tm, in_pad, d, out_pad, num_stage, w_bytes, vmem_capacity):
    """Explicit VMEM budget: single-buffered resident weights/shifts +
    double-buffered x/out tiles + live intermediates, 2x margin, generation-aware cap."""
    weights = (in_pad * d + 2 * num_stage * d * d + d * out_pad) * w_bytes
    vectors = (2 * num_stage + 2) * 8 * max(d, out_pad) * 4
    stream = 2 * tm * in_pad * 4 + 2 * tm * out_pad * 4
    live = 3 * tm * d * 4
    est = 2 * (weights + vectors + stream + live)
    cap = int(vmem_capacity * 0.8)            # headroom for Mosaic internal scratch
    return int(min(max(est, 32 * _MIB), cap))


# --------------------------------------------------------------------------- #
# Host-side parameter folding                                                 #
# --------------------------------------------------------------------------- #
def fold_linear_bn(w, b, gamma, beta, mean, var, eps=1e-5):
    """nn.Linear(out,in) followed by BatchNorm1d (inference).
    Returns (W^T with BN scale folded in [in,out], per-feature shift [out])."""
    scale = gamma / jnp.sqrt(var + eps)
    return w.T * scale[None, :], (b - mean) * scale + beta


def prepare_params(in_layer, stage_layers, out_layer, matmul_dtype=jnp.bfloat16):
    """Fold biases/BN into (weight, shift) pairs and pack stage params.
    Weights are stored in `matmul_dtype` (bf16 default -> MXU-native path);
    shifts / output bias stay f32 (added to the f32 accumulator)."""
    w_in, s_in = fold_linear_bn(*in_layer)
    ws, ss = [], []
    for layer_a, layer_b in stage_layers:
        wa, sa = fold_linear_bn(*layer_a)
        wb, sb = fold_linear_bn(*layer_b)
        ws += [wa, wb]
        ss += [sa, sb]
    w_out, b_out = out_layer
    return (w_in.astype(matmul_dtype),
            s_in.reshape(1, -1).astype(jnp.float32),
            jnp.stack(ws).astype(matmul_dtype),
            jnp.stack(ss).astype(jnp.float32),
            w_out.T.astype(matmul_dtype),
            b_out.reshape(1, -1).astype(jnp.float32))


# --------------------------------------------------------------------------- #
# Forward                                                                     #
# --------------------------------------------------------------------------- #
@jax.jit
def linear_model_forward(x, w_in_t, shift_in, w_stage_t, shift_stage,
                         w_out_t, b_out):
    """Eval-mode LinearModel forward.  x: (N, in_dim) f32 -> (N, out_dim) f32."""
    n, in_dim = x.shape
    d = w_in_t.shape[1]
    out_dim = w_out_t.shape[1]
    num_stage = w_stage_t.shape[0] // 2
    assert d % 128 == 0, "linear_size must be a multiple of 128"
    assert w_in_t.shape[0] == in_dim and w_stage_t.shape[1:] == (d, d)

    vmem_capacity, multi_tc = _tpu_hints()

    # Zero-pad narrow feature dims to full 128-lane tiles (lane-dense IO) and the
    # batch dim to a multiple of the tile (no more tiny-M degenerate matmuls).
    in_pad, out_pad = _round_up(in_dim, 128), _round_up(out_dim, 128)
    n8 = _round_up(n, 8)
    tm = _pick_tm(n8, multi_tc)
    n_pad = _round_up(n8, tm)
    grid = (n_pad // tm,)

    xp = _pad_axis(_pad_axis(x, 1, in_pad), 0, n_pad)
    w_in_p = _pad_axis(w_in_t, 0, in_pad)
    w_out_p = _pad_axis(w_out_t, 1, out_pad)
    b_out_p = _pad_axis(b_out, 1, out_pad)

    def resident(shape):
        # Grid-invariant operand: constant index_map (DMA'd once) + a single
        # VMEM buffer instead of the default double buffer.
        return pl.BlockSpec(shape, lambda i: (0,) * len(shape),
                            pipeline_mode=pl.Buffered(1))

    w_bytes = jnp.dtype(w_stage_t.dtype).itemsize
    weight_bytes = (in_pad * d + 2 * num_stage * d * d + d * out_pad) * w_bytes
    flops = 2 * n_pad * (in_pad * d + 2 * num_stage * d * d + d * out_pad)
    cost = pl.CostEstimate(
        flops=flops,
        transcendentals=0,
        bytes_accessed=weight_bytes + n_pad * (in_pad + out_pad) * 4)

    out_padded = pl.pallas_call(
        functools.partial(_linear_model_kernel, num_stage=num_stage),
        out_shape=jax.ShapeDtypeStruct((n_pad, out_pad), x.dtype),
        grid_spec=pltpu.PrefetchScalarGridSpec(
            num_scalar_prefetch=0,
            grid=grid,
            in_specs=[
                pl.BlockSpec((tm, in_pad), lambda i: (i, 0)),   # x tile (streamed)
                resident((in_pad, d)),                          # W_in^T (BN scale folded)
                resident((1, d)),                               # shift_in
                resident((2 * num_stage, d, d)),                # stage weights^T
                resident((2 * num_stage, d)),                   # stage shifts
                resident((d, out_pad)),                         # W_out^T
                resident((1, out_pad)),                         # b_out
            ],
            out_specs=pl.BlockSpec((tm, out_pad), lambda i: (i, 0)),
        ),
        compiler_params=pltpu.CompilerParams(
            dimension_semantics=("parallel",),
            vmem_limit_bytes=_vmem_limit_bytes(
                tm, in_pad, d, out_pad, num_stage, w_bytes, vmem_capacity),
        ),
        cost_estimate=cost,
    )(xp, w_in_p, shift_in, w_stage_t, shift_stage, w_out_p, b_out_p)

    return out_padded[:n, :out_dim]


# --------------------------------------------------------------------------- #
# Pure-JAX reference (unfolded, eval mode, f32)                               #
# --------------------------------------------------------------------------- #
def _reference(x, in_layer, stage_layers, out_layer, eps=1e-5):
    def lin_bn_relu(h, layer):
        w, b, g, beta, m, v = layer
        y = h @ w.T + b
        y = (y - m) / jnp.sqrt(v + eps) * g + beta
        return jnp.maximum(y, 0.0)

    y = lin_bn_relu(x, in_layer)
    for layer_a, layer_b in stage_layers:
        y = y + lin_bn_relu(lin_bn_relu(y, layer_a), layer_b)
    w, b = out_layer
    return y @ w.T + b


# --------------------------------------------------------------------------- #
# Test                                                                        #
# --------------------------------------------------------------------------- #
if __name__ == "__main__":
    # Small deterministic problem: batch 128, linear_size 256 (PyTorch default
    # is 1024), num_stage 2, input 17*2=34, output 17*3=51.
    N, D, NUM_STAGE = 128, 256, 2
    IN_DIM, OUT_DIM = 17 * 2, 17 * 3

    key = jax.random.PRNGKey(0)
    keys = jax.random.split(key, 2 + 2 * NUM_STAGE + 2)

    def rand_lin_bn(k, fan_in, fan_out):
        ks = jax.random.split(k, 6)
        w = 0.05 * jax.random.normal(ks[0], (fan_out, fan_in), jnp.float32)
        b = 0.1 * jax.random.normal(ks[1], (fan_out,), jnp.float32)
        g = 1.0 + 0.1 * jax.random.normal(ks[2], (fan_out,), jnp.float32)
        beta = 0.1 * jax.random.normal(ks[3], (fan_out,), jnp.float32)
        m = 0.1 * jax.random.normal(ks[4], (fan_out,), jnp.float32)
        v = 1.0 + 0.1 * jax.random.uniform(ks[5], (fan_out,), jnp.float32)
        return (w, b, g, beta, m, v)

    x = jax.random.normal(keys[0], (N, IN_DIM), jnp.float32)
    in_layer = rand_lin_bn(keys[1], IN_DIM, D)
    stage_layers = []
    for s in range(NUM_STAGE):
        layer_a = rand_lin_bn(keys[2 + 2 * s], D, D)
        layer_b = rand_lin_bn(keys[3 + 2 * s], D, D)
        stage_layers.append((layer_a, layer_b))
    w_o = 0.05 * jax.random.normal(keys[2 + 2 * NUM_STAGE], (OUT_DIM, D), jnp.float32)
    b_o = 0.1 * jax.random.normal(keys[3 + 2 * NUM_STAGE], (OUT_DIM,), jnp.float32)
    out_layer = (w_o, b_o)

    ref = _reference(x, in_layer, stage_layers, out_layer)

    # 1) f32-weight path: exact eval-mode semantics, tight tolerance.
    params_f32 = prepare_params(in_layer, stage_layers, out_layer,
                                matmul_dtype=jnp.float32)
    out_f32 = jax.block_until_ready(linear_model_forward(x, *params_f32))
    assert out_f32.shape == (N, OUT_DIM)
    err_f32 = float(jnp.max(jnp.abs(out_f32 - ref)))
    assert jnp.allclose(out_f32, ref, atol=2e-3, rtol=2e-3), \
        f"f32 path max abs err = {err_f32}"

    # 2) Default bf16-weight path (MXU-native): f32 accumulation / residual stream,
    #    so error vs. the f32 reference stays small but is no longer bit-tight.
    params_bf16 = prepare_params(in_layer, stage_layers, out_layer)
    out_bf16 = jax.block_until_ready(linear_model_forward(x, *params_bf16))
    err_bf16 = float(jnp.max(jnp.abs(out_bf16 - ref)))
    assert jnp.allclose(out_bf16, ref, atol=8e-2, rtol=5e-2), \
        f"bf16 path max abs err = {err_bf16}"

    # 3) Awkward batch size exercises the wrapper-side batch padding.
    out_odd = jax.block_until_ready(linear_model_forward(x[:100], *params_f32))
    assert out_odd.shape == (100, OUT_DIM)
    assert jnp.allclose(out_odd, ref[:100], atol=2e-3, rtol=2e-3)

    print("KERNEL_OK")
</pallas_src>

<mosaic_0001>
module attributes {stable_mosaic.version = 11 : i64} {
  func.func @_linear_model_kernel(%arg0: i32, %arg1: memref<128x128xf32, #tpu.memory_space<vmem>>, %arg2: memref<128x256xf32, #tpu.memory_space<vmem>>, %arg3: memref<1x256xf32, #tpu.memory_space<vmem>>, %arg4: memref<4x256x256xf32, #tpu.memory_space<vmem>>, %arg5: memref<4x256xf32, #tpu.memory_space<vmem>>, %arg6: memref<256x128xf32, #tpu.memory_space<vmem>>, %arg7: memref<1x128xf32, #tpu.memory_space<vmem>>, %arg8: memref<128x128xf32, #tpu.memory_space<vmem>>) attributes {dimension_semantics = [#tpu.dimension_semantics<parallel>], iteration_bounds = array<i64: 1>, scalar_prefetch = 0 : i64, scratch_operands = 0 : i64, tpu.core_type = #tpu.core_type<tc>, window_params = [{transform_indices = @transform_0, window_bounds = array<i64: 128, 128>}, {pipeline_mode = #tpu.pipeline_mode<synchronous>, transform_indices = @transform_1, window_bounds = array<i64: 128, 256>}, {pipeline_mode = #tpu.pipeline_mode<synchronous>, transform_indices = @transform_2, window_bounds = array<i64: 1, 256>}, {pipeline_mode = #tpu.pipeline_mode<synchronous>, transform_indices = @transform_3, window_bounds = array<i64: 4, 256, 256>}, {pipeline_mode = #tpu.pipeline_mode<synchronous>, transform_indices = @transform_4, window_bounds = array<i64: 4, 256>}, {pipeline_mode = #tpu.pipeline_mode<synchronous>, transform_indices = @transform_5, window_bounds = array<i64: 256, 128>}, {pipeline_mode = #tpu.pipeline_mode<synchronous>, transform_indices = @transform_6, window_bounds = array<i64: 1, 128>}, {transform_indices = @transform_7, window_bounds = array<i64: 128, 128>}]} {
    %c0 = arith.constant 0 : index
    %c0_0 = arith.constant 0 : index
    %0 = vector.load %arg2[%c0, %c0_0] : memref<128x256xf32, #tpu.memory_space<vmem>>, vector<128x256xf32>
    %c0_1 = arith.constant 0 : index
    %c0_2 = arith.constant 0 : index
    %1 = vector.load %arg1[%c0_1, %c0_2] : memref<128x128xf32, #tpu.memory_space<vmem>>, vector<128x128xf32>
    %cst = arith.constant dense<0.000000e+00> : vector<128x256xf32>
    %2 = tpu.matmul %1, %0, %cst {dimension_numbers = #tpu.dot_dimension_numbers<[1], [0], [0], [1], [0, 0, 1, 1], [], []>} : vector<128x128xf32>, vector<128x256xf32>, vector<128x256xf32> -> vector<128x256xf32>
    %c0_3 = arith.constant 0 : index
    %c0_4 = arith.constant 0 : index
    %3 = vector.load %arg3[%c0_3, %c0_4] : memref<1x256xf32, #tpu.memory_space<vmem>>, vector<1x256xf32>
    %4 = vector.broadcast %3 : vector<1x256xf32> to vector<128x256xf32>
    %5 = arith.addf %2, %4 : vector<128x256xf32>
    %cst_5 = arith.constant 0.000000e+00 : f32
    %6 = vector.broadcast %cst_5 : f32 to vector<128x256xf32>
    %7 = arith.maximumf %5, %6 : vector<128x256xf32>
    %c0_6 = arith.constant 0 : index
    %c0_7 = arith.constant 0 : index
    %c0_8 = arith.constant 0 : index
    %8 = vector.load %arg4[%c0_6, %c0_7, %c0_8] : memref<4x256x256xf32, #tpu.memory_space<vmem>>, vector<1x256x256xf32>
    %9 = vector.shape_cast %8 : vector<1x256x256xf32> to vector<256x256xf32>
    %cst_9 = arith.constant dense<0.000000e+00> : vector<128x256xf32>
    %10 = tpu.matmul %7, %9, %cst_9 {dimension_numbers = #tpu.dot_dimension_numbers<[1], [0], [0], [1], [0, 0, 1, 1], [], []>} : vector<128x256xf32>, vector<256x256xf32>, vector<128x256xf32> -> vector<128x256xf32>
    %c0_10 = arith.constant 0 : index
    %c0_11 = arith.constant 0 : index
    %11 = vector.load %arg5[%c0_10, %c0_11] : memref<4x256xf32, #tpu.memory_space<vmem>>, vector<1x256xf32>
    %12 = vector.broadcast %11 : vector<1x256xf32> to vector<128x256xf32>
    %13 = arith.addf %10, %12 : vector<128x256xf32>
    %cst_12 = arith.constant 0.000000e+00 : f32
    %14 = vector.broadcast %cst_12 : f32 to vector<128x256xf32>
    %15 = arith.maximumf %13, %14 : vector<128x256xf32>
    %c1 = arith.constant 1 : index
    %c0_13 = arith.constant 0 : index
    %c0_14 = arith.constant 0 : index
    %16 = vector.load %arg4[%c1, %c0_13, %c0_14] : memref<4x256x256xf32, #tpu.memory_space<vmem>>, vector<1x256x256xf32>
    %17 = vector.shape_cast %16 : vector<1x256x256xf32> to vector<256x256xf32>
    %cst_15 = arith.constant dense<0.000000e+00> : vector<128x256xf32>
    %18 = tpu.matmul %15, %17, %cst_15 {dimension_numbers = #tpu.dot_dimension_numbers<[1], [0], [0], [1], [0, 0, 1, 1], [], []>} : vector<128x256xf32>, vector<256x256xf32>, vector<128x256xf32> -> vector<128x256xf32>
    %c1_16 = arith.constant 1 : index
    %c0_17 = arith.constant 0 : index
    %19 = vector.load %arg5[%c1_16, %c0_17] : memref<4x256xf32, #tpu.memory_space<vmem>>, vector<1x256xf32>
    %20 = vector.broadcast %19 : vector<1x256xf32> to vector<128x256xf32>
    %21 = arith.addf %18, %20 : vector<128x256xf32>
    %cst_18 = arith.constant 0.000000e+00 : f32
    %22 = vector.broadcast %cst_18 : f32 to vector<128x256xf32>
    %23 = arith.maximumf %21, %22 : vector<128x256xf32>
    %24 = arith.addf %7, %23 : vector<128x256xf32>
    %c2 = arith.constant 2 : index
    %c0_19 = arith.constant 0 : index
    %c0_20 = arith.constant 0 : index
    %25 = vector.load %arg4[%c2, %c0_19, %c0_20] : memref<4x256x256xf32, #tpu.memory_space<vmem>>, vector<1x256x256xf32>
    %26 = vector.shape_cast %25 : vector<1x256x256xf32> to vector<256x256xf32>
    %cst_21 = arith.constant dense<0.000000e+00> : vector<128x256xf32>
    %27 = tpu.matmul %24, %26, %cst_21 {dimension_numbers = #tpu.dot_dimension_numbers<[1], [0], [0], [1], [0, 0, 1, 1], [], []>} : vector<128x256xf32>, vector<256x256xf32>, vector<128x256xf32> -> vector<128x256xf32>
    %c2_22 = arith.constant 2 : index
    %c0_23 = arith.constant 0 : index
    %28 = vector.load %arg5[%c2_22, %c0_23] : memref<4x256xf32, #tpu.memory_space<vmem>>, vector<1x256xf32>
    %29 = vector.broadcast %28 : vector<1x256xf32> to vector<128x256xf32>
    %30 = arith.addf %27, %29 : vector<128x256xf32>
    %cst_24 = arith.constant 0.000000e+00 : f32
    %31 = vector.broadcast %cst_24 : f32 to vector<128x256xf32>
    %32 = arith.maximumf %30, %31 : vector<128x256xf32>
    %c3 = arith.constant 3 : index
    %c0_25 = arith.constant 0 : index
    %c0_26 = arith.constant 0 : index
    %33 = vector.load %arg4[%c3, %c0_25, %c0_26] : memref<4x256x256xf32, #tpu.memory_space<vmem>>, vector<1x256x256xf32>
    %34 = vector.shape_cast %33 : vector<1x256x256xf32> to vector<256x256xf32>
    %cst_27 = arith.constant dense<0.000000e+00> : vector<128x256xf32>
    %35 = tpu.matmul %32, %34, %cst_27 {dimension_numbers = #tpu.dot_dimension_numbers<[1], [0], [0], [1], [0, 0, 1, 1], [], []>} : vector<128x256xf32>, vector<256x256xf32>, vector<128x256xf32> -> vector<128x256xf32>
    %c3_28 = arith.constant 3 : index
    %c0_29 = arith.constant 0 : index
    %36 = vector.load %arg5[%c3_28, %c0_29] : memref<4x256xf32, #tpu.memory_space<vmem>>, vector<1x256xf32>
    %37 = vector.broadcast %36 : vector<1x256xf32> to vector<128x256xf32>
    %38 = arith.addf %35, %37 : vector<128x256xf32>
    %cst_30 = arith.constant 0.000000e+00 : f32
    %39 = vector.broadcast %cst_30 : f32 to vector<128x256xf32>
    %40 = arith.maximumf %38, %39 : vector<128x256xf32>
    %41 = arith.addf %24, %40 : vector<128x256xf32>
    %c0_31 = arith.constant 0 : index
    %c0_32 = arith.constant 0 : index
    %42 = vector.load %arg6[%c0_31, %c0_32] : memref<256x128xf32, #tpu.memory_space<vmem>>, vector<256x128xf32>
    %cst_33 = arith.constant dense<0.000000e+00> : vector<128x128xf32>
    %43 = tpu.matmul %41, %42, %cst_33 {dimension_numbers = #tpu.dot_dimension_numbers<[1], [0], [0], [1], [0, 0, 1, 1], [], []>} : vector<128x256xf32>, vector<256x128xf32>, vector<128x128xf32> -> vector<128x128xf32>
    %c0_34 = arith.constant 0 : index
    %c0_35 = arith.constant 0 : index
    %44 = vector.load %arg7[%c0_34, %c0_35] : memref<1x128xf32, #tpu.memory_space<vmem>>, vector<1x128xf32>
    %45 = vector.broadcast %44 : vector<1x128xf32> to vector<128x128xf32>
    %46 = arith.addf %43, %45 : vector<128x128xf32>
    %c0_36 = arith.constant 0 : index
    %c0_37 = arith.constant 0 : index
    %47 = vector.load %arg8[%c0_36, %c0_37] : memref<128x128xf32, #tpu.memory_space<vmem>>, vector<128x128xf32>
    tpu.vector_store %arg8[%c0_36, %c0_37], %46 {strides = array<i32>} : memref<128x128xf32, #tpu.memory_space<vmem>>, vector<128x128xf32>,
    return
  }
  func.func @transform_0(%arg0: i32) -> (i32, i32) {
    %c0_i32 = arith.constant 0 : i32
    %c0_i32_0 = arith.constant 0 : i32
    return %arg0, %c0_i32 : i32, i32
  }
  func.func @transform_1(%arg0: i32) -> (i32, i32) {
    %c0_i32 = arith.constant 0 : i32
    %c0_i32_0 = arith.constant 0 : i32
    %c0_i32_1 = arith.constant 0 : i32
    return %c0_i32, %c0_i32_0 : i32, i32
  }
  func.func @transform_2(%arg0: i32) -> (i32, i32) {
    %c0_i32 = arith.constant 0 : i32
    %c0_i32_0 = arith.constant 0 : i32
    %c0_i32_1 = arith.constant 0 : i32
    return %c0_i32, %c0_i32_0 : i32, i32
  }
  func.func @transform_3(%arg0: i32) -> (i32, i32, i32) {
    %c0_i32 = arith.constant 0 : i32
    %c0_i32_0 = arith.constant 0 : i32
    %c0_i32_1 = arith.constant 0 : i32
    %c0_i32_2 = arith.constant 0 : i32
    return %c0_i32, %c0_i32_0, %c0_i32_1 : i32, i32, i32
  }
  func.func @transform_4(%arg0: i32) -> (i32, i32) {
    %c0_i32 = arith.constant 0 : i32
    %c0_i32_0 = arith.constant 0 : i32
    %c0_i32_1 = arith.constant 0 : i32
    return %c0_i32, %c0_i32_0 : i32, i32
  }
  func.func @transform_5(%arg0: i32) -> (i32, i32) {
    %c0_i32 = arith.constant 0 : i32
    %c0_i32_0 = arith.constant 0 : i32
    %c0_i32_1 = arith.constant 0 : i32
    return %c0_i32, %c0_i32_0 : i32, i32
  }
  func.func @transform_6(%arg0: i32) -> (i32, i32) {
    %c0_i32 = arith.constant 0 : i32
    %c0_i32_0 = arith.constant 0 : i32
    %c0_i32_1 = arith.constant 0 : i32
    return %c0_i32, %c0_i32_0 : i32, i32
  }
  func.func @transform_7(%arg0: i32) -> (i32, i32) {
    %c0_i32 = arith.constant 0 : i32
    %c0_i32_0 = arith.constant 0 : i32
    return %arg0, %c0_i32 : i32, i32
  }
}

</mosaic_0001>

<bundles_post_ra>
// kernel: linear_model_forward.1
= control target key start
LH: loop header
LB: loop body
LE: loop exit
PB: predicated region body
PF: predicated region fallthrough
CT: control target
= control target key end

     0   :  { %12 = vsyncpa [#allocation3], 0  ;;  %s1786_s24 = smov [#allocation2]   ;;  %s2783_s0 = inlined_call_operand.vmem [shape: f32[128,128], index: 0, kind: input, shape index: {}]   ;;  %s2784_s1 = inlined_call_operand.vmem [shape: f32[128,256], index: 1, kind: input, shape index: {}]   ;;  %s2785_s2 = inlined_call_operand.vmem [shape: f32[1,256], index: 2, kind: input, shape index: {}]   ;;  %s2786_s3 = inlined_call_operand.hbm [shape: f32[4,256,256], index: 3, kind: input, shape index: {}]   ;;  %s2787_s4 = inlined_call_operand.vmem [shape: f32[4,256], index: 4, kind: input, shape index: {}]   ;;  %s2788_s5 = inlined_call_operand.vmem [shape: f32[256,128], index: 5, kind: input, shape index: {}]   ;;  %s2789_s6 = inlined_call_operand.vmem [shape: f32[1,128], index: 6, kind: input, shape index: {}]   ;;  %s2790_s7 = inlined_call_operand.vmem [shape: f32[128,128], index: 7, kind: output, shape index: {}]  }
   0x1   :  { %s24_s25 = sshll.u32 %s1786_s24, 4  ;;  %s25_s25 = int_to_ptr.vmem [resolvable:$true] %s24_s25 }
   0x2   :  { %s1772_s26 = scalar_lea.vmem %s25_s25, 32768  ;;  %p1777_p1 = scmp.lt.s32.totalorder %s25_s25, %s25_s25 }
   0x3   :  { %p1773_p0 = scmp.ne.s32.totalorder %s25_s25, %s1772_s26  ;;  %p1778_p2 = scmp.lt.s32.totalorder %s1772_s26, %s1772_s26 }
   0x5   :  { %p1779_p3 = por %p1778_p2, %p1777_p1 }
   0x7   :  { %p1780_p4 = pnand %p1779_p3, %p1773_p0 }
   0x9   :  { %1783 = shalt.err (!%p1780_p4)
}
   0xa   :  { %s1787_s27 = smov 256   ;;  %s1788_s28 = smov 16  }
   0xb   :  { %30 = dma.hbm_to_vmem [thread:$0]  %s2786_s3, 32768, %s25_s25, [#allocation3], %s1787_s27, %s1787_s27, %s1788_s28  }
   0xc   :  { %1784 = dma.done.wait [#allocation3], 32768  }
   0xd   :  { %1785 = vsyncadd [#allocation3], 4294934528  ;;  %v1789_v0 = vmov 0.0   ;;  %v71_v1 = vld [vmem:[%s2784_s1 + $0xf8] sm:$0xff]  ;;  %v70_v2 = vld [vmem:[%s2784_s1 + $0xf0] sm:$0xff] }
   0xe   :  { %164 = vmatprep.mubr.f32.mxu0 %v1789_v0  ;;  %v69_v3 = vld [vmem:[%s2784_s1 + $0xe8] sm:$0xff]  ;;  %100 = vmatprep.subr.mxu0 %v71_v1  ;;  %v68_v4 = vld [vmem:[%s2784_s1 + $0xe0] sm:$0xff]  ;;  %v67_v5 = vld [vmem:[%s2784_s1 + $0xd8] sm:$0xff] }
   0xf   :  { %101 = vmatpush1.msra.mxu0 %v70_v2  ;;  %v66_v6 = vld [vmem:[%s2784_s1 + $0xd0] sm:$0xff]  ;;  %v65_v7 = vld [vmem:[%s2784_s1 + $0xc8] sm:$0xff]  ;;  %v64_v8 = vld [vmem:[%s2784_s1 + $0xc0] sm:$0xff] }
  0x10   :  { %102 = vmatprep.subr.mxu0 %v69_v3  ;;  %v63_v9 = vld [vmem:[%s2784_s1 + $0xb8] sm:$0xff]  ;;  %v62_v10 = vld [vmem:[%s2784_s1 + $0xb0] sm:$0xff]  ;;  %v61_v11 = vld [vmem:[%s2784_s1 + $0xa8] sm:$0xff] }
  0x11   :  { %103 = vmatpush1.msra.mxu0 %v68_v4  ;;  %v60_v12 = vld [vmem:[%s2784_s1 + $0xa0] sm:$0xff]  ;;  %v59_v13 = vld [vmem:[%s2784_s1 + $0x98] sm:$0xff]  ;;  %v58_v14 = vld [vmem:[%s2784_s1 + $0x90] sm:$0xff] }
  0x12   :  { %104 = vmatprep.subr.mxu0 %v67_v5  ;;  %v57_v15 = vld [vmem:[%s2784_s1 + $0x88] sm:$0xff]  ;;  %v56_v16 = vld [vmem:[%s2784_s1 + $0x80] sm:$0xff]  ;;  %v55_v17 = vld [vmem:[%s2784_s1 + $0x78] sm:$0xff] }
  0x13   :  { %105 = vmatpush1.msra.mxu0 %v66_v6  ;;  %v54_v18 = vld [vmem:[%s2784_s1 + $0x70] sm:$0xff]  ;;  %v53_v19 = vld [vmem:[%s2784_s1 + $0x68] sm:$0xff]  ;;  %v324_v20 = vld [vmem:[#allocation2 + $0xf8] sm:$0xff] }
  0x14   :  { %106 = vmatprep.subr.mxu0 %v65_v7  ;;  %v323_v21 = vld [vmem:[#allocation2 + $0xf0] sm:$0xff]  ;;  %v322_v22 = vld [vmem:[#allocation2 + $0xe8] sm:$0xff]  ;;  %v52_v23 = vld [vmem:[%s2784_s1 + $0x60] sm:$0xff]  ;;  %369 = vmatprep.subr.mxu1 %v324_v20 }
  0x15   :  { %107 = vmatpush1.msra.mxu0 %v64_v8  ;;  %v321_v24 = vld [vmem:[#allocation2 + $0xe0] sm:$0xff]  ;;  %v51_v25 = vld [vmem:[%s2784_s1 + $0x58] sm:$0xff]  ;;  %370 = vmatpush1.msra.mxu1 %v323_v21  ;;  %v50_v27 = vld [vmem:[%s2784_s1 + $0x50] sm:$0xff] }
  0x16   :  { %108 = vmatprep.subr.mxu0 %v63_v9  ;;  %v320_v26 = vld [vmem:[#allocation2 + $0xd8] sm:$0xff]  ;;  %371 = vmatprep.subr.mxu1 %v322_v22  ;;  %v319_v28 = vld [vmem:[#allocation2 + $0xd0] sm:$0xff]  ;;  %v49_v29 = vld [vmem:[%s2784_s1 + $0x48] sm:$0xff] }
  0x17   :  { %109 = vmatpush1.msra.mxu0 %v62_v10  ;;  %372 = vmatpush1.msra.mxu1 %v321_v24  ;;  %v318_v30 = vld [vmem:[#allocation2 + $0xc8] sm:$0xff]  ;;  %v48_v31 = vld [vmem:[%s2784_s1 + $0x40] sm:$0xff]  ;;  %v47_v33 = vld [vmem:[%s2784_s1 + $0x38] sm:$0xff] }
  0x18   :  { %110 = vmatprep.subr.mxu0 %v61_v11  ;;  %373 = vmatprep.subr.mxu1 %v320_v26  ;;  %v317_v32 = vld [vmem:[#allocation2 + $0xc0] sm:$0xff]  ;;  %v316_v34 = vld [vmem:[#allocation2 + $0xb8] sm:$0xff]  ;;  %v46_v35 = vld [vmem:[%s2784_s1 + $0x30] sm:$0xff] }
  0x19   :  { %111 = vmatpush1.msra.mxu0 %v60_v12  ;;  %374 = vmatpush1.msra.mxu1 %v319_v28  ;;  %v315_v36 = vld [vmem:[#allocation2 + $0xb0] sm:$0xff]  ;;  %v45_v37 = vld [vmem:[%s2784_s1 + $0x28] sm:$0xff]  ;;  %v44_v39 = vld [vmem:[%s2784_s1 + $0x20] sm:$0xff] }
  0x1a   :  { %112 = vmatprep.subr.mxu0 %v59_v13  ;;  %375 = vmatprep.subr.mxu1 %v318_v30  ;;  %v314_v38 = vld [vmem:[#allocation2 + $0xa8] sm:$0xff]  ;;  %v313_v40 = vld [vmem:[#allocation2 + $0xa0] sm:$0xff]  ;;  %v43_v41 = vld [vmem:[%s2784_s1 + $0x18] sm:$0xff] }
  0x1b   :  { %113 = vmatpush1.msra.mxu0 %v58_v14  ;;  %376 = vmatpush1.msra.mxu1 %v317_v32  ;;  %v312_v42 = vld [vmem:[#allocation2 + $0x98] sm:$0xff]  ;;  %v42_v43 = vld [vmem:[%s2784_s1 + $0x10] sm:$0xff]  ;;  %v41_v45 = vld [vmem:[%s2784_s1 + $0x8] sm:$0xff] }
  0x1c   :  { %114 = vmatprep.subr.mxu0 %v57_v15  ;;  %377 = vmatprep.subr.mxu1 %v316_v34  ;;  %v311_v44 = vld [vmem:[#allocation2 + $0x90] sm:$0xff]  ;;  %v310_v46 = vld [vmem:[#allocation2 + $0x88] sm:$0xff]  ;;  %v40_v47 = vld [vmem:[%s2784_s1] sm:$0xff] }
  0x1d   :  { %115 = vmatpush1.msra.mxu0 %v56_v16  ;;  %378 = vmatpush1.msra.mxu1 %v315_v36  ;;  %v309_v48 = vld [vmem:[#allocation2 + $0x80] sm:$0xff]  ;;  %v308_v50 = vld [vmem:[#allocation2 + $0x78] sm:$0xff]  ;;  %v307_v51 = vld [vmem:[#allocation2 + $0x70] sm:$0xff] }
  0x1e   :  { %116 = vmatprep.subr.mxu0 %v55_v17  ;;  %379 = vmatprep.subr.mxu1 %v314_v38  ;;  %v72_v49 = vld [vmem:[%s2783_s0] sm:$0xff]  ;;  %v306_v52 = vld [vmem:[#allocation2 + $0x68] sm:$0xff]  ;;  %v304_v55 = vld [vmem:[#allocation2 + $0x58] sm:$0xff] }
  0x1f   :  { %117 = vmatpush1.msra.mxu0 %v54_v18  ;;  %380 = vmatpush1.msra.mxu1 %v313_v40  ;;  %v305_v53 = vld [vmem:[#allocation2 + $0x60] sm:$0xff]  ;;  %v73_v54 = vld [vmem:[%s2783_s0 + $0x8] sm:$0xff]  ;;  %v303_v56 = vld [vmem:[#allocation2 + $0x50] sm:$0xff] }
  0x20   :  { %118 = vmatprep.subr.mxu0 %v53_v19  ;;  %381 = vmatprep.subr.mxu1 %v312_v42  ;;  %v302_v57 = vld [vmem:[#allocation2 + $0x48] sm:$0xff]  ;;  %v301_v58 = vld [vmem:[#allocation2 + $0x40] sm:$0xff]  ;;  %v74_v59 = vld [vmem:[%s2783_s0 + $0x10] sm:$0xff] }
  0x21   :  { %119 = vmatpush1.msra.mxu0 %v52_v23  ;;  %382 = vmatpush1.msra.mxu1 %v311_v44  ;;  %v300_v60 = vld [vmem:[#allocation2 + $0x38] sm:$0xff]  ;;  %v299_v61 = vld [vmem:[#allocation2 + $0x30] sm:$0xff]  ;;  %v298_v62 = vld [vmem:[#allocation2 + $0x28] sm:$0xff] }
  0x22   :  { %120 = vmatprep.subr.mxu0 %v51_v25  ;;  %383 = vmatprep.subr.mxu1 %v310_v46  ;;  %v297_v63 = vld [vmem:[#allocation2 + $0x20] sm:$0xff]  ;;  %v75_v1 = vld [vmem:[%s2783_s0 + $0x18] sm:$0xff]  ;;  %v295_v3 = vld [vmem:[#allocation2 + $0x10] sm:$0xff] }
  0x23   :  { %121 = vmatpush1.msra.mxu0 %v50_v27  ;;  %384 = vmatpush1.msra.mxu1 %v309_v48  ;;  %v296_v2 = vld [vmem:[#allocation2 + $0x18] sm:$0xff]  ;;  %v294_v4 = vld [vmem:[#allocation2 + $0x8] sm:$0xff]  ;;  %v293_v5 = vld [vmem:[#allocation2] sm:$0xff] }
  0x24   :  { %122 = vmatprep.subr.mxu0 %v49_v29  ;;  %385 = vmatprep.subr.mxu1 %v308_v50  ;;  %v76_v6 = vld [vmem:[%s2783_s0 + $0x20] sm:$0xff]  ;;  %v356_v7 = vld [vmem:[#allocation2 + $0x1f8] sm:$0xff]  ;;  %v355_v8 = vld [vmem:[#allocation2 + $0x1f0] sm:$0xff] }
  0x25   :  { %123 = vmatpush1.msra.mxu0 %v48_v31  ;;  %386 = vmatpush1.msra.mxu1 %v307_v51  ;;  %v354_v9 = vld [vmem:[#allocation2 + $0x1e8] sm:$0xff]  ;;  %v353_v10 = vld [vmem:[#allocation2 + $0x1e0] sm:$0xff]  ;;  %v352_v12 = vld [vmem:[#allocation2 + $0x1d8] sm:$0xff] }
  0x26   :  { %124 = vmatprep.subr.mxu0 %v47_v33  ;;  %387 = vmatprep.subr.mxu1 %v306_v52  ;;  %v77_v11 = vld [vmem:[%s2783_s0 + $0x28] sm:$0xff]  ;;  %v351_v13 = vld [vmem:[#allocation2 + $0x1d0] sm:$0xff]  ;;  %v349_v15 = vld [vmem:[#allocation2 + $0x1c0] sm:$0xff] }
  0x27   :  { %125 = vmatpush1.msra.mxu0 %v46_v35  ;;  %388 = vmatpush1.msra.mxu1 %v305_v53  ;;  %v350_v14 = vld [vmem:[#allocation2 + $0x1c8] sm:$0xff]  ;;  %v78_v16 = vld [vmem:[%s2783_s0 + $0x30] sm:$0xff]  ;;  %v348_v17 = vld [vmem:[#allocation2 + $0x1b8] sm:$0xff] }
  0x28   :  { %126 = vmatprep.subr.mxu0 %v45_v37  ;;  %389 = vmatprep.subr.mxu1 %v304_v55  ;;  %v347_v18 = vld [vmem:[#allocation2 + $0x1b0] sm:$0xff]  ;;  %v346_v19 = vld [vmem:[#allocation2 + $0x1a8] sm:$0xff]  ;;  %v345_v20 = vld [vmem:[#allocation2 + $0x1a0] sm:$0xff] }
  0x29   :  { %127 = vmatpush1.msra.mxu0 %v44_v39  ;;  %390 = vmatpush1.msra.mxu1 %v303_v56  ;;  %v79_v21 = vld [vmem:[%s2783_s0 + $0x38] sm:$0xff]  ;;  %v343_v23 = vld [vmem:[#allocation2 + $0x190] sm:$0xff]  ;;  %v342_v24 = vld [vmem:[#allocation2 + $0x188] sm:$0xff] }
  0x2a   :  { %128 = vmatprep.subr.mxu0 %v43_v41  ;;  %391 = vmatprep.subr.mxu1 %v302_v57  ;;  %v344_v22 = vld [vmem:[#allocation2 + $0x198] sm:$0xff]  ;;  %v341_v25 = vld [vmem:[#allocation2 + $0x180] sm:$0xff]  ;;  %v339_v28 = vld [vmem:[#allocation2 + $0x170] sm:$0xff] }
  0x2b   :  { %129 = vmatpush1.msra.mxu0 %v42_v43  ;;  %392 = vmatpush1.msra.mxu1 %v301_v58  ;;  %v80_v26 = vld [vmem:[%s2783_s0 + $0x40] sm:$0xff]  ;;  %v340_v27 = vld [vmem:[#allocation2 + $0x178] sm:$0xff]  ;;  %v338_v29 = vld [vmem:[#allocation2 + $0x168] sm:$0xff] }
  0x2c   :  { %130 = vmatprep.subr.mxu0 %v41_v45  ;;  %393 = vmatprep.subr.mxu1 %v300_v60  ;;  %v337_v30 = vld [vmem:[#allocation2 + $0x160] sm:$0xff]  ;;  %v81_v31 = vld [vmem:[%s2783_s0 + $0x48] sm:$0xff]  ;;  %v336_v32 = vld [vmem:[#allocation2 + $0x158] sm:$0xff] }
  0x2d   :  { %131 = vmatpush1.msra.mxu0 %v40_v47  ;;  %394 = vmatpush1.msra.mxu1 %v299_v61  ;;  %v335_v33 = vld [vmem:[#allocation2 + $0x150] sm:$0xff]  ;;  %v334_v34 = vld [vmem:[#allocation2 + $0x148] sm:$0xff]  ;;  %v333_v35 = vld [vmem:[#allocation2 + $0x140] sm:$0xff] }
  0x2e   :  { %165 = vmatmul.mubr.f32.vlgmr.msra.gmra.mxu0 %v72_v49  ;;  %395 = vmatprep.subr.mxu1 %v298_v62  ;;  %v82_v36 = vld [vmem:[%s2783_s0 + $0x50] sm:$0xff]  ;;  %v83_v37 = vld [vmem:[%s2783_s0 + $0x58] sm:$0xff]  ;;  %v84_v38 = vld [vmem:[%s2783_s0 + $0x60] sm:$0xff] }
  0x2f   :  { %170 = vmatprep.mubr.f32.mxu0 %v1789_v0  ;;  %396 = vmatpush1.msra.mxu1 %v297_v63  ;;  %v85_v39 = vld [vmem:[%s2783_s0 + $0x68] sm:$0xff]  ;;  %v86_v40 = vld [vmem:[%s2783_s0 + $0x70] sm:$0xff]  ;;  %v87_v41 = vld [vmem:[%s2783_s0 + $0x78] sm:$0xff] }
  0x30   :  { %397 = vmatprep.subr.mxu1 %v296_v2  ;;  %v332_v42 = vld [vmem:[#allocation2 + $0x138] sm:$0xff]  ;;  %v331_v43 = vld [vmem:[#allocation2 + $0x130] sm:$0xff]  ;;  %v330_v44 = vld [vmem:[#allocation2 + $0x128] sm:$0xff] }
  0x31   :  { %398 = vmatpush1.msra.mxu1 %v295_v3  ;;  %v329_v45 = vld [vmem:[#allocation2 + $0x120] sm:$0xff]  ;;  %v328_v46 = vld [vmem:[#allocation2 + $0x118] sm:$0xff]  ;;  %v327_v47 = vld [vmem:[#allocation2 + $0x110] sm:$0xff] }
  0x32   :  { %171 = vmatmul.mubr.f32.gmra.mxu0 %v73_v54  ;;  %399 = vmatprep.subr.mxu1 %v294_v4  ;;  %v326_v48 = vld [vmem:[#allocation2 + $0x108] sm:$0xff]  ;;  %v594_v49 = vld [vmem:[#allocation2 + $0x2f8] sm:$0xff]  ;;  %v593_v50 = vld [vmem:[#allocation2 + $0x2f0] sm:$0xff] }
  0x33   :  { %176 = vmatprep.mubr.f32.mxu0 %v1789_v0  ;;  %400 = vmatpush1.msra.mxu1 %v293_v5  ;;  %v592_v51 = vld [vmem:[#allocation2 + $0x2e8] sm:$0xff]  ;;  %v591_v52 = vld [vmem:[#allocation2 + $0x2e0] sm:$0xff]  ;;  %v590_v53 = vld [vmem:[#allocation2 + $0x2d8] sm:$0xff] }
  0x34   :  { %401 = vmatprep.subr.mxu1 %v356_v7  ;;  %640 = vmatprep.subr.mxu0 %v594_v49  ;;  %v589_v54 = vld [vmem:[#allocation2 + $0x2d0] sm:$0xff]  ;;  %v588_v55 = vld [vmem:[#allocation2 + $0x2c8] sm:$0xff]  ;;  %v587_v56 = vld [vmem:[#allocation2 + $0x2c0] sm:$0xff] }
  0x35   :  { %402 = vmatpush2.msra.mxu1 %v355_v8  ;;  %641 = vmatpush1.msra.mxu0 %v593_v50  ;;  %v586_v57 = vld [vmem:[#allocation2 + $0x2b8] sm:$0xff]  ;;  %v585_v58 = vld [vmem:[#allocation2 + $0x2b0] sm:$0xff]  ;;  %v583_v60 = vld [vmem:[#allocation2 + $0x2a0] sm:$0xff] }
  0x36   :  { %177 = vmatmul.mubr.f32.gmra.mxu0 %v74_v59  ;;  %403 = vmatprep.subr.mxu1 %v354_v9  ;;  %v584_v59 = vld [vmem:[#allocation2 + $0x2a8] sm:$0xff]  ;;  %v582_v61 = vld [vmem:[#allocation2 + $0x298] sm:$0xff]  ;;  %v581_v62 = vld [vmem:[#allocation2 + $0x290] sm:$0xff] }
  0x37   :  { %182 = vmatprep.mubr.f32.mxu0 %v1789_v0  ;;  %404 = vmatpush2.msra.mxu1 %v353_v10  ;;  %v580_v63 = vld [vmem:[#allocation2 + $0x288] sm:$0xff]  ;;  %v578_v2 = vld [vmem:[#allocation2 + $0x278] sm:$0xff]  ;;  %v577_v3 = vld [vmem:[#allocation2 + $0x270] sm:$0xff] }
  0x38   :  { %405 = vmatprep.subr.mxu1 %v352_v12  ;;  %642 = vmatprep.subr.mxu0 %v592_v51  ;;  %v576_v4 = vld [vmem:[#allocation2 + $0x268] sm:$0xff]  ;;  %v575_v5 = vld [vmem:[#allocation2 + $0x260] sm:$0xff]  ;;  %v573_v7 = vld [vmem:[#allocation2 + $0x250] sm:$0xff] }
  0x39   :  { %406 = vmatpush2.msra.mxu1 %v351_v13  ;;  %643 = vmatpush1.msra.mxu0 %v591_v52  ;;  %v572_v8 = vld [vmem:[#allocation2 + $0x248] sm:$0xff]  ;;  %v571_v9 = vld [vmem:[#allocation2 + $0x240] sm:$0xff]  ;;  %v570_v10 = vld [vmem:[#allocation2 + $0x238] sm:$0xff] }
  0x3a   :  { %183 = vmatmul.mubr.f32.gmra.mxu0 %v75_v1  ;;  %407 = vmatprep.subr.mxu1 %v350_v14  ;;  %v579_v1 = vld [vmem:[#allocation2 + $0x280] sm:$0xff]  ;;  %v568_v12 = vld [vmem:[#allocation2 + $0x228] sm:$0xff]  ;;  %v566_v14 = vld [vmem:[#allocation2 + $0x218] sm:$0xff] }
  0x3b   :  { %188 = vmatprep.mubr.f32.mxu0 %v1789_v0  ;;  %408 = vmatpush2.msra.mxu1 %v349_v15  ;;  %v567_v13 = vld [vmem:[#allocation2 + $0x220] sm:$0xff]  ;;  %v565_v15 = vld [vmem:[#allocation2 + $0x210] sm:$0xff] }
  0x3c   :  { %409 = vmatprep.subr.mxu1 %v348_v17  ;;  %644 = vmatprep.subr.mxu0 %v590_v53  ;;  %v563_v17 = vld [vmem:[#allocation2 + $0x200] sm:$0xff] }
  0x3d   :  { %410 = vmatpush2.msra.mxu1 %v347_v18  ;;  %645 = vmatpush1.msra.mxu0 %v589_v54  ;;  %v626_v18 = vld [vmem:[#allocation2 + $0x3f8] sm:$0xff] }
  0x3e   :  { %189 = vmatmul.mubr.f32.gmra.mxu0 %v76_v6  ;;  %411 = vmatprep.subr.mxu1 %v346_v19  ;;  %v574_v6 = vld [vmem:[#allocation2 + $0x258] sm:$0xff]  ;;  %v625_v19 = vld [vmem:[#allocation2 + $0x3f0] sm:$0xff] }
  0x3f   :  { %194 = vmatprep.mubr.f32.mxu0 %v1789_v0  ;;  %412 = vmatpush2.msra.mxu1 %v345_v20  ;;  %v624_v20 = vld [vmem:[#allocation2 + $0x3e8] sm:$0xff] }
  0x40   :  { %413 = vmatprep.subr.mxu1 %v344_v22  ;;  %646 = vmatprep.subr.mxu0 %v588_v55  ;;  %v622_v22 = vld [vmem:[#allocation2 + $0x3d8] sm:$0xff] }
  0x41   :  { %414 = vmatpush2.msra.mxu1 %v343_v23  ;;  %647 = vmatpush1.msra.mxu0 %v587_v56  ;;  %v621_v23 = vld [vmem:[#allocation2 + $0x3d0] sm:$0xff] }
  0x42   :  { %195 = vmatmul.mubr.f32.gmra.mxu0 %v77_v11  ;;  %415 = vmatprep.subr.mxu1 %v342_v24  ;;  %v569_v11 = vld [vmem:[#allocation2 + $0x230] sm:$0xff]  ;;  %v620_v24 = vld [vmem:[#allocation2 + $0x3c8] sm:$0xff] }
  0x43   :  { %200 = vmatprep.mubr.f32.mxu0 %v1789_v0  ;;  %416 = vmatpush2.msra.mxu1 %v341_v25  ;;  %v619_v25 = vld [vmem:[#allocation2 + $0x3c0] sm:$0xff] }
  0x44   :  { %417 = vmatprep.subr.mxu1 %v340_v27  ;;  %648 = vmatprep.subr.mxu0 %v586_v57  ;;  %v617_v27 = vld [vmem:[#allocation2 + $0x3b0] sm:$0xff] }
  0x45   :  { %418 = vmatpush2.msra.mxu1 %v339_v28  ;;  %649 = vmatpush1.msra.mxu0 %v585_v58  ;;  %v616_v28 = vld [vmem:[#allocation2 + $0x3a8] sm:$0xff] }
  0x46   :  { %201 = vmatmul.mubr.f32.gmra.mxu0 %v78_v16  ;;  %419 = vmatprep.subr.mxu1 %v338_v29  ;;  %v564_v16 = vld [vmem:[#allocation2 + $0x208] sm:$0xff]  ;;  %v615_v29 = vld [vmem:[#allocation2 + $0x3a0] sm:$0xff] }
  0x47   :  { %206 = vmatprep.mubr.f32.mxu0 %v1789_v0  ;;  %420 = vmatpush2.msra.mxu1 %v337_v30  ;;  %v614_v30 = vld [vmem:[#allocation2 + $0x398] sm:$0xff] }
  0x48   :  { %421 = vmatprep.subr.mxu1 %v336_v32  ;;  %650 = vmatprep.subr.mxu0 %v584_v59  ;;  %v612_v32 = vld [vmem:[#allocation2 + $0x388] sm:$0xff] }
  0x49   :  { %422 = vmatpush2.msra.mxu1 %v335_v33  ;;  %651 = vmatpush1.msra.mxu0 %v583_v60  ;;  %v611_v33 = vld [vmem:[#allocation2 + $0x380] sm:$0xff] }
  0x4a   :  { %207 = vmatmul.mubr.f32.gmra.mxu0 %v79_v21  ;;  %423 = vmatprep.subr.mxu1 %v334_v34  ;;  %v623_v21 = vld [vmem:[#allocation2 + $0x3e0] sm:$0xff]  ;;  %v90_v34 = vlaneseq }
  0x4b   :  { %212 = vmatprep.mubr.f32.mxu0 %v1789_v0  ;;  %424 = vmatpush2.msra.mxu1 %v333_v35  ;;  %v610_v35 = vld [vmem:[#allocation2 + $0x378] sm:$0xff] }
  0x4c   :  { %425 = vmatprep.subr.mxu1 %v332_v42  ;;  %652 = vmatprep.subr.mxu0 %v582_v61  ;;  %v604_v42 = vld [vmem:[#allocation2 + $0x348] sm:$0xff] }
  0x4d   :  { %426 = vmatpush2.msra.mxu1 %v331_v43  ;;  %653 = vmatpush1.msra.mxu0 %v581_v62  ;;  %v603_v43 = vld [vmem:[#allocation2 + $0x340] sm:$0xff] }
  0x4e   :  { %213 = vmatmul.mubr.f32.gmra.mxu0 %v80_v26  ;;  %427 = vmatprep.subr.mxu1 %v330_v44  ;;  %v618_v26 = vld [vmem:[#allocation2 + $0x3b8] sm:$0xff] }
  0x4f   :  { %218 = vmatprep.mubr.f32.mxu0 %v1789_v0  ;;  %428 = vmatpush2.msra.mxu1 %v329_v45  ;;  %v602_v45 = vld [vmem:[#allocation2 + $0x338] sm:$0xff] }
  0x50   :  { %429 = vmatprep.subr.mxu1 %v328_v46  ;;  %654 = vmatprep.subr.mxu0 %v580_v63  ;;  %v88_v46 = vld [vmem:[%s2785_s2] sm:$0x3] }
  0x51   :  { %430 = vmatpush2.msra.mxu1 %v327_v47  ;;  %655 = vmatpush1.msra.mxu0 %v579_v1 }
  0x52   :  { %219 = vmatmul.mubr.f32.gmra.mxu0 %v81_v31  ;;  %431 = vmatprep.subr.mxu1 %v326_v48  ;;  %v613_v31 = vld [vmem:[#allocation2 + $0x390] sm:$0xff] }
  0x53   :  { %224 = vmatprep.mubr.f32.mxu0 %v1789_v0  ;;  %656 = vmatprep.subr.mxu0 %v578_v2 }
  0x54   :  { %657 = vmatpush1.msra.mxu0 %v577_v3 }
  0x55   :  { %658 = vmatprep.subr.mxu0 %v576_v4 }
  0x56   :  { %225 = vmatmul.mubr.f32.gmra.mxu0 %v82_v36  ;;  %v609_v36 = vld [vmem:[#allocation2 + $0x370] sm:$0xff] }
  0x57   :  { %230 = vmatprep.mubr.f32.mxu0 %v1789_v0  ;;  %659 = vmatpush1.msra.mxu0 %v575_v5 }
  0x58   :  { %660 = vmatprep.subr.mxu0 %v574_v6 }
  0x59   :  { %661 = vmatpush1.msra.mxu0 %v573_v7 }
  0x5a   :  { %231 = vmatmul.mubr.f32.gmra.mxu0 %v83_v37  ;;  %662 = vmatprep.subr.mxu0 %v572_v8  ;;  %v608_v37 = vld [vmem:[#allocation2 + $0x368] sm:$0xff] }
  0x5b   :  { %236 = vmatprep.mubr.f32.mxu0 %v1789_v0  ;;  %663 = vmatpush1.msra.mxu0 %v571_v9 }
  0x5c   :  { %664 = vmatprep.subr.mxu0 %v570_v10 }
  0x5d   :  { %665 = vmatpush1.msra.mxu0 %v569_v11 }
  0x5e   :  { %237 = vmatmul.mubr.f32.gmra.mxu0 %v84_v38  ;;  %666 = vmatprep.subr.mxu0 %v568_v12  ;;  %v607_v38 = vld [vmem:[#allocation2 + $0x360] sm:$0xff] }
  0x5f   :  { %242 = vmatprep.mubr.f32.mxu0 %v1789_v0  ;;  %667 = vmatpush1.msra.mxu0 %v567_v13 }
  0x60   :  { %668 = vmatprep.subr.mxu0 %v566_v14 }
  0x61   :  { %669 = vmatpush1.msra.mxu0 %v565_v15 }
  0x62   :  { %243 = vmatmul.mubr.f32.gmra.mxu0 %v85_v39  ;;  %670 = vmatprep.subr.mxu0 %v564_v16  ;;  %v91_v39 = vshrl.u32 %v90_v34, 7 }
  0x63   :  { %248 = vmatprep.mubr.f32.mxu0 %v1789_v0  ;;  %671 = vmatpush1.msra.mxu0 %v563_v17 }
  0x64   :  { %672 = vmatprep.subr.mxu0 %v626_v18  ;;  %v1993_v44 = vsub.s32 0, %v91_v39  ;;  %v1998_v47 = vsub.s32 1, %v91_v39 }
  0x65   :  { %673 = vmatpush2.msra.mxu0 %v625_v19 }
  0x66   :  { %249 = vmatmul.mubr.f32.gmra.mxu0 %v86_v40  ;;  %674 = vmatprep.subr.mxu0 %v624_v20  ;;  %v606_v40 = vld [vmem:[#allocation2 + $0x358] sm:$0xff]  ;;  %v2001_v48 = vrot.slane %v88_v46, %v1993_v44 }
  0x67   :  { %254 = vmatprep.mubr.f32.mxu0 %v1789_v0  ;;  %v325_v0 = vld [vmem:[#allocation2 + $0x100] sm:$0xff]  ;;  %675 = vmatpush2.msra.mxu0 %v623_v21 }
  0x68   :  { %432 = vmatpush2.msra.mxu1 %v325_v0  ;;  %676 = vmatprep.subr.mxu0 %v622_v22  ;;  %v2004_v0 = vrot.slane %v88_v46, %v1998_v47 }
  0x69   :  { %677 = vmatpush2.msra.mxu0 %v621_v23 }
  0x6a   :  { %255 = vmatmul.mubr.f32.gmra.mxu0 %v87_v41  ;;  %678 = vmatprep.subr.mxu0 %v620_v24  ;;  %v605_v41 = vld [vmem:[#allocation2 + $0x350] sm:$0xff] }
  0x6b   :  { %679 = vmatpush2.msra.mxu0 %v619_v25 }
  0x6c   :  { %680 = vmatprep.subr.mxu0 %v618_v26 }
  0x6d   :  { %681 = vmatpush2.msra.mxu0 %v617_v27 }
  0x6e   :  { %682 = vmatprep.subr.mxu0 %v616_v28 }
  0x6f   :  { %683 = vmatpush2.msra.mxu0 %v615_v29 }
  0x70   :  { %684 = vmatprep.subr.mxu0 %v614_v30 }
  0x71   :  { %685 = vmatpush2.msra.mxu0 %v613_v31 }
  0x72   :  { %686 = vmatprep.subr.mxu0 %v612_v32 }
  0x73   :  { %687 = vmatpush2.msra.mxu0 %v611_v33 }
  0x74   :  { %688 = vmatprep.subr.mxu0 %v610_v35 }
  0x75   :  { %689 = vmatpush2.msra.mxu0 %v609_v36 }
  0x76   :  { %690 = vmatprep.subr.mxu0 %v608_v37 }
  0x77   :  { %691 = vmatpush2.msra.mxu0 %v607_v38 }
  0x78   :  { %692 = vmatprep.subr.mxu0 %v606_v40 }
  0x79   :  { %693 = vmatpush2.msra.mxu0 %v605_v41 }
  0x7a   :  { %694 = vmatprep.subr.mxu0 %v604_v42 }
  0x7b   :  { %695 = vmatpush2.msra.mxu0 %v603_v43 }
  0x7c   :  { %696 = vmatprep.subr.mxu0 %v602_v45 }
  0xee   :  { %v166_v49 = vpop.f32.mrf.mxu0 }
  0xef   :  { %v2007_v50 = vadd.f32 %v166_v49, %v2001_v48 }
  0xf0   :  { %v168_v51 = vpop.f32.mrf.mxu0 }
  0xf1   :  { %v2010_v52 = vadd.f32 %v168_v51, %v2004_v0  ;;  %v261_v55 = vmax.f32 %v2007_v50, 0.0 }
  0xf2   :  { %v172_v53 = vpop.f32.mrf.mxu0 }
  0xf3   :  { %v262_v54 = vmax.f32 %v2010_v52, 0.0  ;;  %v2015_v56 = vadd.f32 %v172_v53, %v2001_v48 }
  0xf4   :  { %v174_v57 = vpop.f32.mrf.mxu0 }
  0xf5   :  { %v2018_v58 = vadd.f32 %v174_v57, %v2004_v0  ;;  %433 = vmatprep.mubr.f32.mxu1 %v262_v54  ;;  %v263_v61 = vmax.f32 %v2015_v56, 0.0 }
  0xf6   :  { %v178_v59 = vpop.f32.mrf.mxu0  ;;  %434 = vmatmul.mubr.f32.vlgmr.msra.gmra.mxu1 %v261_v55 }
  0xf7   :  { %v264_v60 = vmax.f32 %v2018_v58, 0.0  ;;  %v2027_v62 = vadd.f32 %v178_v59, %v2001_v48 }
  0xf8   :  { %v180_v63 = vpop.f32.mrf.mxu0 }
  0xf9   :  { %v2030_v1 = vadd.f32 %v180_v63, %v2004_v0  ;;  %439 = vmatprep.mubr.f32.mxu1 %v264_v60  ;;  %v265_v4 = vmax.f32 %v2027_v62, 0.0 }
  0xfa   :  { %v184_v2 = vpop.f32.mrf.mxu0  ;;  %440 = vmatmul.mubr.f32.gmra.mxu1 %v263_v61 }
  0xfb   :  { %v266_v3 = vmax.f32 %v2030_v1, 0.0  ;;  %v2039_v5 = vadd.f32 %v184_v2, %v2001_v48 }
  0xfc   :  { %v186_v6 = vpop.f32.mrf.mxu0 }
  0xfd   :  { %v2042_v7 = vadd.f32 %v186_v6, %v2004_v0  ;;  %445 = vmatprep.mubr.f32.mxu1 %v266_v3  ;;  %v267_v10 = vmax.f32 %v2039_v5, 0.0 }
  0xfe   :  { %v190_v8 = vpop.f32.mrf.mxu0  ;;  %446 = vmatmul.mubr.f32.gmra.mxu1 %v265_v4 }
  0xff   :  { %v268_v9 = vmax.f32 %v2042_v7, 0.0  ;;  %v2051_v11 = vadd.f32 %v190_v8, %v2001_v48 }
 0x100   :  { %v192_v12 = vpop.f32.mrf.mxu0 }
 0x101   :  { %v2054_v13 = vadd.f32 %v192_v12, %v2004_v0  ;;  %451 = vmatprep.mubr.f32.mxu1 %v268_v9  ;;  %v269_v16 = vmax.f32 %v2051_v11, 0.0 }
 0x102   :  { %v196_v14 = vpop.f32.mrf.mxu0  ;;  %452 = vmatmul.mubr.f32.gmra.mxu1 %v267_v10 }
 0x103   :  { %v270_v15 = vmax.f32 %v2054_v13, 0.0  ;;  %v2063_v17 = vadd.f32 %v196_v14, %v2001_v48 }
 0x104   :  { %v198_v18 = vpop.f32.mrf.mxu0 }
 0x105   :  { %v2066_v19 = vadd.f32 %v198_v18, %v2004_v0  ;;  %457 = vmatprep.mubr.f32.mxu1 %v270_v15  ;;  %v271_v22 = vmax.f32 %v2063_v17, 0.0 }
 0x106   :  { %v202_v20 = vpop.f32.mrf.mxu0  ;;  %458 = vmatmul.mubr.f32.gmra.mxu1 %v269_v16 }
 0x107   :  { %v272_v21 = vmax.f32 %v2066_v19, 0.0  ;;  %v2075_v23 = vadd.f32 %v202_v20, %v2001_v48 }
 0x108   :  { %v204_v24 = vpop.f32.mrf.mxu0 }
 0x109   :  { %v2078_v25 = vadd.f32 %v204_v24, %v2004_v0  ;;  %463 = vmatprep.mubr.f32.mxu1 %v272_v21  ;;  %v2809_v28 = vmax.f32 %v2075_v23, 0.0  ;;  %v2819_v17 = vmax.f32 %v2075_v23, 0.0 }
 0x10a   :  { %v208_v26 = vpop.f32.mrf.mxu0  ;;  %464 = vmatmul.mubr.f32.gmra.mxu1 %v271_v22 }
 0x10b   :  { %v2810_v27 = vmax.f32 %v2078_v25, 0.0  ;;  %v2087_v29 = vadd.f32 %v208_v26, %v2001_v48  ;;  %v2818_v19 = vmax.f32 %v2078_v25, 0.0 }
 0x10c   :  { %v210_v30 = vpop.f32.mrf.mxu0 }
 0x10d   :  { %v2090_v31 = vadd.f32 %v210_v30, %v2004_v0  ;;  %469 = vmatprep.mubr.f32.mxu1 %v2810_v27  ;;  %v2807_v34 = vmax.f32 %v2087_v29, 0.0  ;;  %v2821_v23 = vmax.f32 %v2087_v29, 0.0 }
 0x10e   :  { %v214_v32 = vpop.f32.mrf.mxu0  ;;  %470 = vmatmul.mubr.f32.gmra.mxu1 %v2809_v28 }
 0x10f   :  { %v2808_v33 = vmax.f32 %v2090_v31, 0.0  ;;  %v2099_v35 = vadd.f32 %v214_v32, %v2001_v48  ;;  %v2820_v25 = vmax.f32 %v2090_v31, 0.0 }
 0x110   :  { %v216_v36 = vpop.f32.mrf.mxu0 }
 0x111   :  { %v2102_v37 = vadd.f32 %v216_v36, %v2004_v0  ;;  %475 = vmatprep.mubr.f32.mxu1 %v2808_v33  ;;  %v2805_v40 = vmax.f32 %v2099_v35, 0.0  ;;  %v2823_v29 = vmax.f32 %v2099_v35, 0.0 }
 0x112   :  { %v220_v38 = vpop.f32.mrf.mxu0  ;;  %476 = vmatmul.mubr.f32.gmra.mxu1 %v2807_v34 }
 0x113   :  { %v2806_v39 = vmax.f32 %v2102_v37, 0.0  ;;  %v2111_v41 = vadd.f32 %v220_v38, %v2001_v48  ;;  %v2822_v31 = vmax.f32 %v2102_v37, 0.0 }
 0x114   :  { %v222_v42 = vpop.f32.mrf.mxu0 }
 0x115   :  { %v2114_v43 = vadd.f32 %v222_v42, %v2004_v0  ;;  %481 = vmatprep.mubr.f32.mxu1 %v2806_v39  ;;  %v2801_v49 = vmax.f32 %v2111_v41, 0.0  ;;  %v2825_v35 = vmax.f32 %v2111_v41, 0.0 }
 0x116   :  { %v226_v45 = vpop.f32.mrf.mxu0  ;;  %482 = vmatmul.mubr.f32.gmra.mxu1 %v2805_v40  ;;  %v885_v40 = vld [vmem:[#allocation2 + $0x498] sm:$0xff] }
 0x117   :  { %v2803_v46 = vmax.f32 %v2114_v43, 0.0  ;;  %v2123_v51 = vadd.f32 %v226_v45, %v2001_v48  ;;  %v2824_v37 = vmax.f32 %v2114_v43, 0.0 }
 0x118   :  { %v228_v53 = vpop.f32.mrf.mxu0 }
 0x119   :  { %v2126_v57 = vadd.f32 %v228_v53, %v2004_v0  ;;  %487 = vmatprep.mubr.f32.mxu1 %v2803_v46  ;;  %v2795_v2 = vmax.f32 %v2123_v51, 0.0  ;;  %v894_v46 = vld [vmem:[#allocation2 + $0x4e0] sm:$0xff]  ;;  %v2827_v41 = vmax.f32 %v2123_v51, 0.0 }
 0x11a   :  { %v232_v59 = vpop.f32.mrf.mxu0  ;;  %488 = vmatmul.mubr.f32.gmra.mxu1 %v2801_v49  ;;  %v896_v49 = vld [vmem:[#allocation2 + $0x4f0] sm:$0xff] }
 0x11b   :  { %v2800_v63 = vmax.f32 %v2126_v57, 0.0  ;;  %v2135_v6 = vadd.f32 %v232_v59, %v2001_v48  ;;  %v2826_v43 = vmax.f32 %v2126_v57, 0.0 }
 0x11c   :  { %v234_v8 = vpop.f32.mrf.mxu0 }
 0x11d   :  { %v2138_v12 = vadd.f32 %v234_v8, %v2004_v0  ;;  %493 = vmatprep.mubr.f32.mxu1 %v2800_v63  ;;  %v2791_v20 = vmax.f32 %v2135_v6, 0.0  ;;  %v897_v63 = vld [vmem:[#allocation2 + $0x4f8] sm:$0xff]  ;;  %v2829_v51 = vmax.f32 %v2135_v6, 0.0 }
 0x11e   :  { %v238_v14 = vpop.f32.mrf.mxu0  ;;  %494 = vmatmul.mubr.f32.gmra.mxu1 %v2795_v2  ;;  %943 = vmatprep.subr.mxu1 %v897_v63  ;;  %v884_v63 = vld [vmem:[#allocation2 + $0x490] sm:$0xff] }
 0x11f   :  { %v2794_v18 = vmax.f32 %v2138_v12, 0.0  ;;  %v2147_v24 = vadd.f32 %v238_v14, %v2001_v48  ;;  %944 = vmatpush1.msra.mxu1 %v896_v49  ;;  %v883_v49 = vld [vmem:[#allocation2 + $0x488] sm:$0xff]  ;;  %v2828_v57 = vmax.f32 %v2138_v12, 0.0 }
 0x120   :  { %v240_v26 = vpop.f32.mrf.mxu0 }
 0x121   :  { %v2150_v30 = vadd.f32 %v240_v26, %v2004_v0  ;;  %499 = vmatprep.mubr.f32.mxu1 %v2794_v18  ;;  %v2792_v38 = vmax.f32 %v2147_v24, 0.0  ;;  %v2831_v6 = vmax.f32 %v2147_v24, 0.0 }
 0x122   :  { %v244_v32 = vpop.f32.mrf.mxu0  ;;  %500 = vmatmul.mubr.f32.gmra.mxu1 %v2791_v20 }
 0x123   :  { %v2793_v36 = vmax.f32 %v2150_v30, 0.0  ;;  %v2159_v42 = vadd.f32 %v244_v32, %v2001_v48  ;;  %v2830_v12 = vmax.f32 %v2150_v30, 0.0 }
 0x124   :  { %v246_v45 = vpop.f32.mrf.mxu0 }
 0x125   :  { %v2162_v53 = vadd.f32 %v246_v45, %v2004_v0  ;;  %505 = vmatprep.mubr.f32.mxu1 %v2793_v36  ;;  %v2796_v14 = vmax.f32 %v2159_v42, 0.0  ;;  %v2835_v24 = vmax.f32 %v2159_v42, 0.0 }
 0x126   :  { %v250_v59 = vpop.f32.mrf.mxu0  ;;  %506 = vmatmul.mubr.f32.gmra.mxu1 %v2792_v38 }
 0x127   :  { %v2799_v8 = vmax.f32 %v2162_v53, 0.0  ;;  %v2171_v26 = vadd.f32 %v250_v59, %v2001_v48  ;;  %v2833_v30 = vmax.f32 %v2162_v53, 0.0 }
 0x128   :  { %v252_v32 = vpop.f32.mrf.mxu0 }
 0x129   :  { %v2174_v20 = vadd.f32 %v252_v32, %v2004_v0  ;;  %511 = vmatprep.mubr.f32.mxu1 %v2799_v8  ;;  %v2798_v36 = vmax.f32 %v2171_v26, 0.0  ;;  %v595_v8 = vld [vmem:[#allocation2 + $0x300] sm:$0xff]  ;;  %v2839_v42 = vmax.f32 %v2171_v26, 0.0  ;;  %v1175_v26 = vld [vmem:[#allocation2 + $0x730] sm:$0xff] }
 0x12a   :  { %v256_v45 = vpop.f32.mrf.mxu0  ;;  %512 = vmatmul.mubr.f32.gmra.mxu1 %v2796_v14 }
 0x12b   :  { %v2797_v38 = vmax.f32 %v2174_v20, 0.0  ;;  %v2183_v18 = vadd.f32 %v256_v45, %v2001_v48  ;;  %v601_v48 = vld [vmem:[#allocation2 + $0x330] sm:$0xff]  ;;  %v599_v45 = vld [vmem:[#allocation2 + $0x320] sm:$0xff]  ;;  %v2837_v53 = vmax.f32 %v2174_v20, 0.0 }
 0x12c   :  { %v258_v59 = vpop.f32.mrf.mxu0  ;;  %697 = vmatpush2.msra.mxu0 %v601_v48  ;;  %v892_v48 = vld [vmem:[#allocation2 + $0x4d0] sm:$0xff] }
 0x12d   :  { %v2186_v2 = vadd.f32 %v258_v59, %v2004_v0  ;;  %517 = vmatprep.mubr.f32.mxu1 %v2797_v38  ;;  %v2804_v14 = vmax.f32 %v2183_v18, 0.0  ;;  %v600_v0 = vld [vmem:[#allocation2 + $0x328] sm:$0xff]  ;;  %v598_v59 = vld [vmem:[#allocation2 + $0x318] sm:$0xff]  ;;  %v597_v38 = vld [vmem:[#allocation2 + $0x310] sm:$0xff]  ;;  %v2843_v20 = vmax.f32 %v2183_v18, 0.0 }
 0x12e   :  { %518 = vmatmul.mubr.f32.gmra.mxu1 %v2798_v36  ;;  %698 = vmatprep.subr.mxu0 %v600_v0  ;;  %v596_v36 = vld [vmem:[#allocation2 + $0x308] sm:$0xff]  ;;  %v1470_v18 = vld [vmem:[%s2788_s5 + $0xf8] sm:$0xff] }
 0x12f   :  { %v2802_v32 = vmax.f32 %v2186_v2, 0.0  ;;  %699 = vmatpush2.msra.mxu0 %v599_v45  ;;  %v891_v0 = vld [vmem:[#allocation2 + $0x4c8] sm:$0xff]  ;;  %v890_v45 = vld [vmem:[#allocation2 + $0x4c0] sm:$0xff] }
 0x130   :  { %700 = vmatprep.subr.mxu0 %v598_v59  ;;  %v889_v59 = vld [vmem:[#allocation2 + $0x4b8] sm:$0xff] }
 0x131   :  { %523 = vmatprep.mubr.f32.mxu1 %v2802_v32  ;;  %701 = vmatpush2.msra.mxu0 %v597_v38  ;;  %v895_v32 = vld [vmem:[#allocation2 + $0x4e8] sm:$0xff]  ;;  %v888_v38 = vld [vmem:[#allocation2 + $0x4b0] sm:$0xff] }
 0x132   :  { %524 = vmatmul.mubr.f32.gmra.mxu1 %v2804_v14  ;;  %702 = vmatprep.subr.mxu0 %v596_v36  ;;  %v893_v14 = vld [vmem:[#allocation2 + $0x4d8] sm:$0xff]  ;;  %v887_v36 = vld [vmem:[#allocation2 + $0x4a8] sm:$0xff] }
 0x133   :  { %703 = vmatpush2.msra.mxu0 %v595_v8  ;;  %945 = vmatprep.subr.mxu1 %v895_v32  ;;  %v886_v8 = vld [vmem:[#allocation2 + $0x4a0] sm:$0xff] }
 0x134   :  { %946 = vmatpush1.msra.mxu1 %v894_v46  ;;  %v882_v32 = vld [vmem:[#allocation2 + $0x480] sm:$0xff]  ;;  %v881_v46 = vld [vmem:[#allocation2 + $0x478] sm:$0xff] }
 0x135   :  { %947 = vmatprep.subr.mxu1 %v893_v14  ;;  %v880_v14 = vld [vmem:[#allocation2 + $0x470] sm:$0xff] }
 0x136   :  { %948 = vmatpush1.msra.mxu1 %v892_v48  ;;  %v879_v48 = vld [vmem:[#allocation2 + $0x468] sm:$0xff] }
 0x137   :  { %949 = vmatprep.subr.mxu1 %v891_v0  ;;  %v878_v0 = vld [vmem:[#allocation2 + $0x460] sm:$0xff] }
 0x138   :  { %950 = vmatpush1.msra.mxu1 %v890_v45  ;;  %v877_v45 = vld [vmem:[#allocation2 + $0x458] sm:$0xff] }
 0x139   :  { %951 = vmatprep.subr.mxu1 %v889_v59  ;;  %v876_v59 = vld [vmem:[#allocation2 + $0x450] sm:$0xff] }
 0x13a   :  { %952 = vmatpush1.msra.mxu1 %v888_v38  ;;  %v875_v38 = vld [vmem:[#allocation2 + $0x448] sm:$0xff] }
 0x13b   :  { %953 = vmatprep.subr.mxu1 %v887_v36  ;;  %v874_v36 = vld [vmem:[#allocation2 + $0x440] sm:$0xff] }
 0x13c   :  { %954 = vmatpush1.msra.mxu1 %v886_v8  ;;  %v873_v8 = vld [vmem:[#allocation2 + $0x438] sm:$0xff] }
 0x13d   :  { %955 = vmatprep.subr.mxu1 %v885_v40  ;;  %v872_v40 = vld [vmem:[#allocation2 + $0x430] sm:$0xff] }
 0x13e   :  { %956 = vmatpush1.msra.mxu1 %v884_v63  ;;  %v871_v63 = vld [vmem:[#allocation2 + $0x428] sm:$0xff] }
 0x13f   :  { %957 = vmatprep.subr.mxu1 %v883_v49  ;;  %v870_v49 = vld [vmem:[#allocation2 + $0x420] sm:$0xff] }
 0x140   :  { %958 = vmatpush1.msra.mxu1 %v882_v32  ;;  %v869_v32 = vld [vmem:[#allocation2 + $0x418] sm:$0xff] }
 0x141   :  { %959 = vmatprep.subr.mxu1 %v881_v46  ;;  %v868_v46 = vld [vmem:[#allocation2 + $0x410] sm:$0xff] }
 0x142   :  { %960 = vmatpush1.msra.mxu1 %v880_v14  ;;  %v867_v14 = vld [vmem:[#allocation2 + $0x408] sm:$0xff] }
 0x143   :  { %961 = vmatprep.subr.mxu1 %v879_v48  ;;  %v866_v48 = vld [vmem:[#allocation2 + $0x400] sm:$0xff] }
 0x144   :  { %962 = vmatpush1.msra.mxu1 %v878_v0  ;;  %v929_v0 = vld [vmem:[#allocation2 + $0x5f8] sm:$0xff] }
 0x145   :  { %963 = vmatprep.subr.mxu1 %v877_v45  ;;  %v928_v45 = vld [vmem:[#allocation2 + $0x5f0] sm:$0xff] }
 0x146   :  { %964 = vmatpush1.msra.mxu1 %v876_v59  ;;  %v927_v59 = vld [vmem:[#allocation2 + $0x5e8] sm:$0xff] }
 0x147   :  { %965 = vmatprep.subr.mxu1 %v875_v38  ;;  %v926_v38 = vld [vmem:[#allocation2 + $0x5e0] sm:$0xff] }
 0x148   :  { %966 = vmatpush1.msra.mxu1 %v874_v36  ;;  %v925_v36 = vld [vmem:[#allocation2 + $0x5d8] sm:$0xff] }
 0x149   :  { %967 = vmatprep.subr.mxu1 %v873_v8  ;;  %v924_v8 = vld [vmem:[#allocation2 + $0x5d0] sm:$0xff] }
 0x14a   :  { %968 = vmatpush1.msra.mxu1 %v872_v40  ;;  %v923_v40 = vld [vmem:[#allocation2 + $0x5c8] sm:$0xff] }
 0x14b   :  { %969 = vmatprep.subr.mxu1 %v871_v63  ;;  %v922_v63 = vld [vmem:[#allocation2 + $0x5c0] sm:$0xff] }
 0x14c   :  { %970 = vmatpush1.msra.mxu1 %v870_v49  ;;  %v921_v49 = vld [vmem:[#allocation2 + $0x5b8] sm:$0xff] }
 0x14d   :  { %971 = vmatprep.subr.mxu1 %v869_v32  ;;  %v920_v32 = vld [vmem:[#allocation2 + $0x5b0] sm:$0xff] }
 0x14e   :  { %972 = vmatpush1.msra.mxu1 %v868_v46  ;;  %v919_v46 = vld [vmem:[#allocation2 + $0x5a8] sm:$0xff] }
 0x14f   :  { %973 = vmatprep.subr.mxu1 %v867_v14  ;;  %v918_v14 = vld [vmem:[#allocation2 + $0x5a0] sm:$0xff] }
 0x150   :  { %974 = vmatpush1.msra.mxu1 %v866_v48  ;;  %v917_v48 = vld [vmem:[#allocation2 + $0x598] sm:$0xff] }
 0x151   :  { %975 = vmatprep.subr.mxu1 %v929_v0  ;;  %v916_v0 = vld [vmem:[#allocation2 + $0x590] sm:$0xff] }
 0x152   :  { %976 = vmatpush2.msra.mxu1 %v928_v45  ;;  %v915_v45 = vld [vmem:[#allocation2 + $0x588] sm:$0xff] }
 0x153   :  { %977 = vmatprep.subr.mxu1 %v927_v59  ;;  %v914_v59 = vld [vmem:[#allocation2 + $0x580] sm:$0xff] }
 0x154   :  { %978 = vmatpush2.msra.mxu1 %v926_v38  ;;  %v913_v38 = vld [vmem:[#allocation2 + $0x578] sm:$0xff] }
 0x155   :  { %979 = vmatprep.subr.mxu1 %v925_v36  ;;  %v912_v36 = vld [vmem:[#allocation2 + $0x570] sm:$0xff] }
 0x156   :  { %980 = vmatpush2.msra.mxu1 %v924_v8  ;;  %v911_v8 = vld [vmem:[#allocation2 + $0x568] sm:$0xff] }
 0x157   :  { %981 = vmatprep.subr.mxu1 %v923_v40  ;;  %v910_v40 = vld [vmem:[#allocation2 + $0x560] sm:$0xff] }
 0x158   :  { %982 = vmatpush2.msra.mxu1 %v922_v63  ;;  %v909_v63 = vld [vmem:[#allocation2 + $0x558] sm:$0xff] }
 0x159   :  { %983 = vmatprep.subr.mxu1 %v921_v49  ;;  %v908_v49 = vld [vmem:[#allocation2 + $0x550] sm:$0xff] }
 0x15a   :  { %984 = vmatpush2.msra.mxu1 %v920_v32  ;;  %v907_v32 = vld [vmem:[#allocation2 + $0x548] sm:$0xff] }
 0x15b   :  { %985 = vmatprep.subr.mxu1 %v919_v46  ;;  %v357_v46 = vld [vmem:[%s2787_s4] ss:$4 sm:$0x3] }
 0x15c   :  { %986 = vmatpush2.msra.mxu1 %v918_v14  ;;  %v2202_v14 = vrot.slane %v357_v46, %v1993_v44 }
 0x15d   :  { %987 = vmatprep.subr.mxu1 %v917_v48  ;;  %v2205_v48 = vrot.slane %v357_v46, %v1998_v47 }
 0x15e   :  { %988 = vmatpush2.msra.mxu1 %v916_v0 }
 0x15f   :  { %989 = vmatprep.subr.mxu1 %v915_v45 }
 0x160   :  { %990 = vmatpush2.msra.mxu1 %v914_v59 }
 0x161   :  { %991 = vmatprep.subr.mxu1 %v913_v38 }
 0x162   :  { %992 = vmatpush2.msra.mxu1 %v912_v36 }
 0x163   :  { %993 = vmatprep.subr.mxu1 %v911_v8 }
 0x164   :  { %994 = vmatpush2.msra.mxu1 %v910_v40 }
 0x165   :  { %995 = vmatprep.subr.mxu1 %v909_v63 }
 0x166   :  { %996 = vmatpush2.msra.mxu1 %v908_v49 }
 0x167   :  { %997 = vmatprep.subr.mxu1 %v907_v32 }
 0x1b6   :  { %v435_v0 = vpop.f32.mrf.mxu1 }
 0x1b7   :  { %v436_v45 = vadd.f32 %v435_v0, %v2202_v14 }
 0x1b8   :  { %v437_v59 = vpop.f32.mrf.mxu1 }
 0x1b9   :  { %v438_v38 = vadd.f32 %v437_v59, %v2205_v48  ;;  %v530_v40 = vmax.f32 %v436_v45, 0.0 }
 0x1ba   :  { %v441_v36 = vpop.f32.mrf.mxu1 }
 0x1bb   :  { %v531_v8 = vmax.f32 %v438_v38, 0.0  ;;  %v442_v63 = vadd.f32 %v441_v36, %v2202_v14 }
 0x1bc   :  { %v443_v49 = vpop.f32.mrf.mxu1 }
 0x1bd   :  { %v444_v32 = vadd.f32 %v443_v49, %v2205_v48  ;;  %704 = vmatprep.mubr.f32.mxu0 %v531_v8  ;;  %v532_v46 = vmax.f32 %v442_v63, 0.0 }
 0x1be   :  { %v447_v39 = vpop.f32.mrf.mxu1  ;;  %705 = vmatmul.mubr.f32.vlgmr.msra.gmra.mxu0 %v530_v40 }
 0x1bf   :  { %v533_v34 = vmax.f32 %v444_v32, 0.0  ;;  %v448_v33 = vadd.f32 %v447_v39, %v2202_v14 }
 0x1c0   :  { %v449_v28 = vpop.f32.mrf.mxu1 }
 0x1c1   :  { %v450_v0 = vadd.f32 %v449_v28, %v2205_v48  ;;  %710 = vmatprep.mubr.f32.mxu0 %v533_v34  ;;  %v534_v45 = vmax.f32 %v448_v33, 0.0 }
 0x1c2   :  { %v453_v59 = vpop.f32.mrf.mxu1  ;;  %711 = vmatmul.mubr.f32.gmra.mxu0 %v532_v46 }
 0x1c3   :  { %v535_v38 = vmax.f32 %v450_v0, 0.0  ;;  %v454_v36 = vadd.f32 %v453_v59, %v2202_v14 }
 0x1c4   :  { %v455_v27 = vpop.f32.mrf.mxu1 }
 0x1c5   :  { %v456_v49 = vadd.f32 %v455_v27, %v2205_v48  ;;  %716 = vmatprep.mubr.f32.mxu0 %v535_v38  ;;  %v536_v63 = vmax.f32 %v454_v36, 0.0 }
 0x1c6   :  { %v459_v8 = vpop.f32.mrf.mxu1  ;;  %717 = vmatmul.mubr.f32.gmra.mxu0 %v534_v45 }
 0x1c7   :  { %v537_v40 = vmax.f32 %v456_v49, 0.0  ;;  %v460_v39 = vadd.f32 %v459_v8, %v2202_v14 }
 0x1c8   :  { %v461_v32 = vpop.f32.mrf.mxu1 }
 0x1c9   :  { %v462_v28 = vadd.f32 %v461_v32, %v2205_v48  ;;  %722 = vmatprep.mubr.f32.mxu0 %v537_v40  ;;  %v538_v33 = vmax.f32 %v460_v39, 0.0 }
 0x1ca   :  { %v465_v34 = vpop.f32.mrf.mxu1  ;;  %723 = vmatmul.mubr.f32.gmra.mxu0 %v536_v63 }
 0x1cb   :  { %v539_v46 = vmax.f32 %v462_v28, 0.0  ;;  %v466_v0 = vadd.f32 %v465_v34, %v2202_v14 }
 0x1cc   :  { %v467_v59 = vpop.f32.mrf.mxu1 }
 0x1cd   :  { %v468_v27 = vadd.f32 %v467_v59, %v2205_v48  ;;  %728 = vmatprep.mubr.f32.mxu0 %v539_v46  ;;  %v540_v36 = vmax.f32 %v466_v0, 0.0 }
 0x1ce   :  { %v471_v38 = vpop.f32.mrf.mxu1  ;;  %729 = vmatmul.mubr.f32.gmra.mxu0 %v538_v33 }
 0x1cf   :  { %v541_v45 = vmax.f32 %v468_v27, 0.0  ;;  %v472_v49 = vadd.f32 %v471_v38, %v2202_v14 }
 0x1d0   :  { %v473_v8 = vpop.f32.mrf.mxu1 }
 0x1d1   :  { %v474_v32 = vadd.f32 %v473_v8, %v2205_v48  ;;  %734 = vmatprep.mubr.f32.mxu0 %v541_v45  ;;  %v542_v39 = vmax.f32 %v472_v49, 0.0 }
 0x1d2   :  { %v477_v40 = vpop.f32.mrf.mxu1  ;;  %735 = vmatmul.mubr.f32.gmra.mxu0 %v540_v36 }
 0x1d3   :  { %v543_v63 = vmax.f32 %v474_v32, 0.0  ;;  %v478_v28 = vadd.f32 %v477_v40, %v2202_v14 }
 0x1d4   :  { %v479_v34 = vpop.f32.mrf.mxu1 }
 0x1d5   :  { %v480_v59 = vadd.f32 %v479_v34, %v2205_v48  ;;  %740 = vmatprep.mubr.f32.mxu0 %v543_v63  ;;  %v544_v0 = vmax.f32 %v478_v28, 0.0 }
 0x1d6   :  { %v483_v46 = vpop.f32.mrf.mxu1  ;;  %741 = vmatmul.mubr.f32.gmra.mxu0 %v542_v39 }
 0x1d7   :  { %v545_v33 = vmax.f32 %v480_v59, 0.0  ;;  %v484_v27 = vadd.f32 %v483_v46, %v2202_v14 }
 0x1d8   :  { %v485_v38 = vpop.f32.mrf.mxu1 }
 0x1d9   :  { %v486_v8 = vadd.f32 %v485_v38, %v2205_v48  ;;  %746 = vmatprep.mubr.f32.mxu0 %v545_v33  ;;  %v546_v49 = vmax.f32 %v484_v27, 0.0 }
 0x1da   :  { %v489_v45 = vpop.f32.mrf.mxu1  ;;  %747 = vmatmul.mubr.f32.gmra.mxu0 %v544_v0 }
 0x1db   :  { %v547_v36 = vmax.f32 %v486_v8, 0.0  ;;  %v490_v32 = vadd.f32 %v489_v45, %v2202_v14 }
 0x1dc   :  { %v491_v40 = vpop.f32.mrf.mxu1 }
 0x1dd   :  { %v492_v34 = vadd.f32 %v491_v40, %v2205_v48  ;;  %752 = vmatprep.mubr.f32.mxu0 %v547_v36  ;;  %v548_v28 = vmax.f32 %v490_v32, 0.0 }
 0x1de   :  { %v495_v63 = vpop.f32.mrf.mxu1  ;;  %753 = vmatmul.mubr.f32.gmra.mxu0 %v546_v49 }
 0x1df   :  { %v549_v39 = vmax.f32 %v492_v34, 0.0  ;;  %v496_v59 = vadd.f32 %v495_v63, %v2202_v14 }
 0x1e0   :  { %v497_v46 = vpop.f32.mrf.mxu1 }
 0x1e1   :  { %v498_v38 = vadd.f32 %v497_v46, %v2205_v48  ;;  %758 = vmatprep.mubr.f32.mxu0 %v549_v39  ;;  %v550_v27 = vmax.f32 %v496_v59, 0.0 }
 0x1e2   :  { %v501_v33 = vpop.f32.mrf.mxu1  ;;  %759 = vmatmul.mubr.f32.gmra.mxu0 %v548_v28 }
 0x1e3   :  { %v551_v0 = vmax.f32 %v498_v38, 0.0  ;;  %v502_v8 = vadd.f32 %v501_v33, %v2202_v14 }
 0x1e4   :  { %v503_v45 = vpop.f32.mrf.mxu1 }
 0x1e5   :  { %v504_v40 = vadd.f32 %v503_v45, %v2205_v48  ;;  %764 = vmatprep.mubr.f32.mxu0 %v551_v0  ;;  %v552_v32 = vmax.f32 %v502_v8, 0.0 }
 0x1e6   :  { %v507_v36 = vpop.f32.mrf.mxu1  ;;  %765 = vmatmul.mubr.f32.gmra.mxu0 %v550_v27 }
 0x1e7   :  { %v553_v49 = vmax.f32 %v504_v40, 0.0  ;;  %v508_v34 = vadd.f32 %v507_v36, %v2202_v14 }
 0x1e8   :  { %v509_v63 = vpop.f32.mrf.mxu1 }
 0x1e9   :  { %v510_v46 = vadd.f32 %v509_v63, %v2205_v48  ;;  %770 = vmatprep.mubr.f32.mxu0 %v553_v49  ;;  %v554_v59 = vmax.f32 %v508_v34, 0.0 }
 0x1ea   :  { %v513_v39 = vpop.f32.mrf.mxu1  ;;  %771 = vmatmul.mubr.f32.gmra.mxu0 %v552_v32 }
 0x1eb   :  { %v555_v28 = vmax.f32 %v510_v46, 0.0  ;;  %v514_v38 = vadd.f32 %v513_v39, %v2202_v14 }
 0x1ec   :  { %v515_v33 = vpop.f32.mrf.mxu1 }
 0x1ed   :  { %v516_v45 = vadd.f32 %v515_v33, %v2205_v48  ;;  %776 = vmatprep.mubr.f32.mxu0 %v555_v28  ;;  %v556_v8 = vmax.f32 %v514_v38, 0.0  ;;  %v906_v38 = vld [vmem:[#allocation2 + $0x540] sm:$0xff] }
 0x1ee   :  { %v519_v0 = vpop.f32.mrf.mxu1  ;;  %777 = vmatmul.mubr.f32.gmra.mxu0 %v554_v59  ;;  %998 = vmatpush2.msra.mxu1 %v906_v38  ;;  %v1159_v38 = vld [vmem:[#allocation2 + $0x6b0] sm:$0xff] }
 0x1ef   :  { %v557_v27 = vmax.f32 %v516_v45, 0.0  ;;  %v520_v40 = vadd.f32 %v519_v0, %v2202_v14  ;;  %v905_v45 = vld [vmem:[#allocation2 + $0x538] sm:$0xff]  ;;  %v904_v0 = vld [vmem:[#allocation2 + $0x530] sm:$0xff] }
 0x1f0   :  { %v521_v36 = vpop.f32.mrf.mxu1  ;;  %999 = vmatprep.subr.mxu1 %v905_v45  ;;  %v1158_v45 = vld [vmem:[#allocation2 + $0x6a8] sm:$0xff] }
 0x1f1   :  { %v522_v63 = vadd.f32 %v521_v36, %v2205_v48  ;;  %782 = vmatprep.mubr.f32.mxu0 %v557_v27  ;;  %v558_v34 = vmax.f32 %v520_v40, 0.0  ;;  %1000 = vmatpush2.msra.mxu1 %v904_v0  ;;  %v903_v27 = vld [vmem:[#allocation2 + $0x528] sm:$0xff]  ;;  %v900_v40 = vld [vmem:[#allocation2 + $0x510] sm:$0xff]  ;;  %v898_v36 = vld [vmem:[#allocation2 + $0x500] sm:$0xff] }
 0x1f2   :  { %v525_v49 = vpop.f32.mrf.mxu1  ;;  %783 = vmatmul.mubr.f32.gmra.mxu0 %v556_v8  ;;  %1001 = vmatprep.subr.mxu1 %v903_v27  ;;  %v902_v8 = vld [vmem:[#allocation2 + $0x520] sm:$0xff]  ;;  %v1156_v27 = vld [vmem:[#allocation2 + $0x698] sm:$0xff] }
 0x1f3   :  { %v559_v32 = vmax.f32 %v522_v63, 0.0  ;;  %v526_v46 = vadd.f32 %v525_v49, %v2202_v14  ;;  %1002 = vmatpush2.msra.mxu1 %v902_v8  ;;  %v901_v14 = vld [vmem:[#allocation2 + $0x518] sm:$0xff]  ;;  %v1167_v49 = vld [vmem:[#allocation2 + $0x6f0] sm:$0xff]  ;;  %v1157_v0 = vld [vmem:[#allocation2 + $0x6a0] sm:$0xff] }
 0x1f4   :  { %v527_v39 = vpop.f32.mrf.mxu1  ;;  %1003 = vmatprep.subr.mxu1 %v901_v14  ;;  %v1168_v63 = vld [vmem:[#allocation2 + $0x6f8] sm:$0xff]  ;;  %v1155_v8 = vld [vmem:[#allocation2 + $0x690] sm:$0xff]  ;;  %v1154_v14 = vld [vmem:[#allocation2 + $0x688] sm:$0xff] }
 0x1f5   :  { %v528_v33 = vadd.f32 %v527_v39, %v2205_v48  ;;  %788 = vmatprep.mubr.f32.mxu0 %v559_v32  ;;  %v560_v59 = vmax.f32 %v526_v46, 0.0  ;;  %1004 = vmatpush2.msra.mxu1 %v900_v40  ;;  %v899_v48 = vld [vmem:[#allocation2 + $0x508] sm:$0xff]  ;;  %v1164_v46 = vld [vmem:[#allocation2 + $0x6d8] sm:$0xff]  ;;  %v1163_v39 = vld [vmem:[#allocation2 + $0x6d0] sm:$0xff] }
 0x1f6   :  { %789 = vmatmul.mubr.f32.gmra.mxu0 %v558_v34  ;;  %1005 = vmatprep.subr.mxu1 %v899_v48  ;;  %v1166_v32 = vld [vmem:[#allocation2 + $0x6e8] sm:$0xff]  ;;  %v1165_v34 = vld [vmem:[#allocation2 + $0x6e0] sm:$0xff]  ;;  %v1152_v48 = vld [vmem:[#allocation2 + $0x678] sm:$0xff] }
 0x1f7   :  { %v561_v28 = vmax.f32 %v528_v33, 0.0  ;;  %1006 = vmatpush2.msra.mxu1 %v898_v36  ;;  %1214 = vmatprep.subr.mxu0 %v1168_v63  ;;  %v1162_v33 = vld [vmem:[#allocation2 + $0x6c8] sm:$0xff]  ;;  %v1153_v40 = vld [vmem:[#allocation2 + $0x680] sm:$0xff]  ;;  %v1151_v36 = vld [vmem:[#allocation2 + $0x670] sm:$0xff] }
 0x1f8   :  { %1215 = vmatpush1.msra.mxu0 %v1167_v49  ;;  %v1150_v63 = vld [vmem:[#allocation2 + $0x668] sm:$0xff]  ;;  %v1149_v49 = vld [vmem:[#allocation2 + $0x660] sm:$0xff]  ;;  %1728 = vmatprep.subr.mxu1 %v1470_v18 }
 0x1f9   :  { %794 = vmatprep.mubr.f32.mxu0 %v561_v28  ;;  %1216 = vmatprep.subr.mxu0 %v1166_v32  ;;  %v1161_v28 = vld [vmem:[#allocation2 + $0x6c0] sm:$0xff]  ;;  %v1148_v32 = vld [vmem:[#allocation2 + $0x658] sm:$0xff] }
 0x1fa   :  { %795 = vmatmul.mubr.f32.gmra.mxu0 %v560_v59  ;;  %v1160_v59 = vld [vmem:[#allocation2 + $0x6b8] sm:$0xff] }
 0x1fb   :  { %1217 = vmatpush1.msra.mxu0 %v1165_v34  ;;  %v1147_v34 = vld [vmem:[#allocation2 + $0x650] sm:$0xff] }
 0x1fc   :  { %1218 = vmatprep.subr.mxu0 %v1164_v46  ;;  %v1146_v46 = vld [vmem:[#allocation2 + $0x648] sm:$0xff] }
 0x1fd   :  { %1219 = vmatpush1.msra.mxu0 %v1163_v39  ;;  %v1145_v39 = vld [vmem:[#allocation2 + $0x640] sm:$0xff] }
 0x1fe   :  { %1220 = vmatprep.subr.mxu0 %v1162_v33  ;;  %v1144_v33 = vld [vmem:[#allocation2 + $0x638] sm:$0xff] }
 0x1ff   :  { %1221 = vmatpush1.msra.mxu0 %v1161_v28  ;;  %v1143_v28 = vld [vmem:[#allocation2 + $0x630] sm:$0xff] }
 0x200   :  { %1222 = vmatprep.subr.mxu0 %v1160_v59  ;;  %v1142_v59 = vld [vmem:[#allocation2 + $0x628] sm:$0xff] }
 0x201   :  { %1223 = vmatpush1.msra.mxu0 %v1159_v38  ;;  %v1141_v38 = vld [vmem:[#allocation2 + $0x620] sm:$0xff] }
 0x202   :  { %1224 = vmatprep.subr.mxu0 %v1158_v45  ;;  %v1140_v45 = vld [vmem:[#allocation2 + $0x618] sm:$0xff] }
 0x203   :  { %1225 = vmatpush1.msra.mxu0 %v1157_v0  ;;  %v1139_v0 = vld [vmem:[#allocation2 + $0x610] sm:$0xff] }
 0x204   :  { %1226 = vmatprep.subr.mxu0 %v1156_v27  ;;  %v1138_v27 = vld [vmem:[#allocation2 + $0x608] sm:$0xff] }
 0x205   :  { %1227 = vmatpush1.msra.mxu0 %v1155_v8  ;;  %v1137_v8 = vld [vmem:[#allocation2 + $0x600] sm:$0xff] }
 0x206   :  { %1228 = vmatprep.subr.mxu0 %v1154_v14  ;;  %v1200_v14 = vld [vmem:[#allocation2 + $0x7f8] sm:$0xff] }
 0x207   :  { %1229 = vmatpush1.msra.mxu0 %v1153_v40  ;;  %v1199_v40 = vld [vmem:[#allocation2 + $0x7f0] sm:$0xff] }
 0x208   :  { %1230 = vmatprep.subr.mxu0 %v1152_v48  ;;  %v1198_v48 = vld [vmem:[#allocation2 + $0x7e8] sm:$0xff] }
 0x209   :  { %1231 = vmatpush1.msra.mxu0 %v1151_v36  ;;  %v1197_v36 = vld [vmem:[#allocation2 + $0x7e0] sm:$0xff] }
 0x20a   :  { %1232 = vmatprep.subr.mxu0 %v1150_v63  ;;  %v1196_v63 = vld [vmem:[#allocation2 + $0x7d8] sm:$0xff] }
 0x20b   :  { %1233 = vmatpush1.msra.mxu0 %v1149_v49  ;;  %v1195_v49 = vld [vmem:[#allocation2 + $0x7d0] sm:$0xff] }
 0x20c   :  { %1234 = vmatprep.subr.mxu0 %v1148_v32  ;;  %v1194_v32 = vld [vmem:[#allocation2 + $0x7c8] sm:$0xff] }
 0x20d   :  { %1235 = vmatpush1.msra.mxu0 %v1147_v34  ;;  %v1193_v34 = vld [vmem:[#allocation2 + $0x7c0] sm:$0xff] }
 0x20e   :  { %1236 = vmatprep.subr.mxu0 %v1146_v46  ;;  %v1192_v46 = vld [vmem:[#allocation2 + $0x7b8] sm:$0xff] }
 0x20f   :  { %1237 = vmatpush1.msra.mxu0 %v1145_v39  ;;  %v1191_v39 = vld [vmem:[#allocation2 + $0x7b0] sm:$0xff] }
 0x210   :  { %1238 = vmatprep.subr.mxu0 %v1144_v33  ;;  %v1190_v33 = vld [vmem:[#allocation2 + $0x7a8] sm:$0xff] }
 0x211   :  { %1239 = vmatpush1.msra.mxu0 %v1143_v28  ;;  %v1189_v28 = vld [vmem:[#allocation2 + $0x7a0] sm:$0xff] }
 0x212   :  { %1240 = vmatprep.subr.mxu0 %v1142_v59  ;;  %v1188_v59 = vld [vmem:[#allocation2 + $0x798] sm:$0xff] }
 0x213   :  { %1241 = vmatpush1.msra.mxu0 %v1141_v38  ;;  %v1187_v38 = vld [vmem:[#allocation2 + $0x790] sm:$0xff] }
 0x214   :  { %1242 = vmatprep.subr.mxu0 %v1140_v45  ;;  %v1186_v45 = vld [vmem:[#allocation2 + $0x788] sm:$0xff] }
 0x215   :  { %1243 = vmatpush1.msra.mxu0 %v1139_v0  ;;  %v1185_v0 = vld [vmem:[#allocation2 + $0x780] sm:$0xff] }
 0x216   :  { %1244 = vmatprep.subr.mxu0 %v1138_v27  ;;  %v1184_v27 = vld [vmem:[#allocation2 + $0x778] sm:$0xff] }
 0x217   :  { %1245 = vmatpush1.msra.mxu0 %v1137_v8  ;;  %v1183_v8 = vld [vmem:[#allocation2 + $0x770] sm:$0xff] }
 0x218   :  { %1246 = vmatprep.subr.mxu0 %v1200_v14  ;;  %v1182_v14 = vld [vmem:[#allocation2 + $0x768] sm:$0xff] }
 0x219   :  { %1247 = vmatpush2.msra.mxu0 %v1199_v40  ;;  %v1181_v40 = vld [vmem:[#allocation2 + $0x760] sm:$0xff] }
 0x21a   :  { %1248 = vmatprep.subr.mxu0 %v1198_v48  ;;  %v1180_v48 = vld [vmem:[#allocation2 + $0x758] sm:$0xff] }
 0x21b   :  { %1249 = vmatpush2.msra.mxu0 %v1197_v36  ;;  %v1179_v36 = vld [vmem:[#allocation2 + $0x750] sm:$0xff] }
 0x21c   :  { %1250 = vmatprep.subr.mxu0 %v1196_v63  ;;  %v1644_v63 = vld [vmem:[%s2787_s4 + $0x1] ss:$4 sm:$0x3] }
 0x21d   :  { %1251 = vmatpush2.msra.mxu0 %v1195_v49  ;;  %v1178_v49 = vld [vmem:[#allocation2 + $0x748] sm:$0xff] }
 0x21e   :  { %1252 = vmatprep.subr.mxu0 %v1194_v32  ;;  %v1177_v32 = vld [vmem:[#allocation2 + $0x740] sm:$0xff] }
 0x21f   :  { %1253 = vmatpush2.msra.mxu0 %v1193_v34  ;;  %v1176_v34 = vld [vmem:[#allocation2 + $0x738] sm:$0xff] }
 0x220   :  { %1254 = vmatprep.subr.mxu0 %v1192_v46  ;;  %v2243_v46 = vrot.slane %v1644_v63, %v1993_v44 }
 0x221   :  { %1255 = vmatpush2.msra.mxu0 %v1191_v39  ;;  %v2246_v39 = vrot.slane %v1644_v63, %v1998_v47 }
 0x222   :  { %1256 = vmatprep.subr.mxu0 %v1190_v33 }
 0x223   :  { %1257 = vmatpush2.msra.mxu0 %v1189_v28 }
 0x224   :  { %1258 = vmatprep.subr.mxu0 %v1188_v59 }
 0x225   :  { %1259 = vmatpush2.msra.mxu0 %v1187_v38 }
 0x226   :  { %1260 = vmatprep.subr.mxu0 %v1186_v45 }
 0x227   :  { %1261 = vmatpush2.msra.mxu0 %v1185_v0 }
 0x228   :  { %1262 = vmatprep.subr.mxu0 %v1184_v27 }
 0x229   :  { %1263 = vmatpush2.msra.mxu0 %v1183_v8 }
 0x22a   :  { %1264 = vmatprep.subr.mxu0 %v1182_v14 }
 0x22b   :  { %1265 = vmatpush2.msra.mxu0 %v1181_v40 }
 0x22c   :  { %1266 = vmatprep.subr.mxu0 %v1180_v48 }
 0x22d   :  { %1267 = vmatpush2.msra.mxu0 %v1179_v36 }
 0x22e   :  { %1268 = vmatprep.subr.mxu0 %v1178_v49 }
 0x22f   :  { %1269 = vmatpush2.msra.mxu0 %v1177_v32 }
 0x230   :  { %1270 = vmatprep.subr.mxu0 %v1176_v34 }
 0x231   :  { %1271 = vmatpush2.msra.mxu0 %v1175_v26 }
 0x27e   :  { %v706_v33 = vpop.f32.mrf.mxu0 }
 0x27f   :  { %v707_v28 = vadd.f32 %v706_v33, %v2243_v46 }
 0x280   :  { %v708_v59 = vpop.f32.mrf.mxu0 }
 0x281   :  { %v709_v38 = vadd.f32 %v708_v59, %v2246_v39  ;;  %v801_v45 = vmax.f32 %v707_v28, 0.0 }
 0x282   :  { %v712_v0 = vpop.f32.mrf.mxu0 }
 0x283   :  { %v802_v27 = vmax.f32 %v709_v38, 0.0  ;;  %v713_v8 = vadd.f32 %v712_v0, %v2243_v46  ;;  %v2258_v36 = vadd.f32 %v801_v45, %v261_v55 }
 0x284   :  { %v714_v14 = vpop.f32.mrf.mxu0 }
 0x285   :  { %v2253_v40 = vadd.f32 %v802_v27, %v262_v54  ;;  %v715_v48 = vadd.f32 %v714_v14, %v2246_v39  ;;  %v803_v63 = vmax.f32 %v713_v8, 0.0 }
 0x286   :  { %v718_v49 = vpop.f32.mrf.mxu0 }
 0x287   :  { %v804_v32 = vmax.f32 %v715_v48, 0.0  ;;  %v719_v34 = vadd.f32 %v718_v49, %v2243_v46  ;;  %1007 = vmatprep.mubr.f32.mxu1 %v2253_v40  ;;  %v2270_v50 = vadd.f32 %v803_v63, %v263_v61 }
 0x288   :  { %v720_v33 = vpop.f32.mrf.mxu0  ;;  %1008 = vmatmul.mubr.f32.vlgmr.msra.gmra.mxu1 %v2258_v36 }
 0x289   :  { %v2265_v52 = vadd.f32 %v804_v32, %v264_v60  ;;  %v721_v54 = vadd.f32 %v720_v33, %v2246_v39  ;;  %v805_v55 = vmax.f32 %v719_v34, 0.0 }
 0x28a   :  { %v724_v28 = vpop.f32.mrf.mxu0 }
 0x28b   :  { %v806_v59 = vmax.f32 %v721_v54, 0.0  ;;  %v725_v38 = vadd.f32 %v724_v28, %v2243_v46  ;;  %1013 = vmatprep.mubr.f32.mxu1 %v2265_v52  ;;  %v2282_v56 = vadd.f32 %v805_v55, %v265_v4 }
 0x28c   :  { %v726_v45 = vpop.f32.mrf.mxu0  ;;  %1014 = vmatmul.mubr.f32.gmra.mxu1 %v2270_v50 }
 0x28d   :  { %v2277_v58 = vadd.f32 %v806_v59, %v266_v3  ;;  %v727_v60 = vadd.f32 %v726_v45, %v2246_v39  ;;  %v807_v61 = vmax.f32 %v725_v38, 0.0 }
 0x28e   :  { %v730_v0 = vpop.f32.mrf.mxu0 }
 0x28f   :  { %v808_v27 = vmax.f32 %v727_v60, 0.0  ;;  %v731_v8 = vadd.f32 %v730_v0, %v2243_v46  ;;  %1019 = vmatprep.mubr.f32.mxu1 %v2277_v58  ;;  %v2294_v62 = vadd.f32 %v807_v61, %v267_v10 }
 0x290   :  { %v732_v14 = vpop.f32.mrf.mxu0  ;;  %1020 = vmatmul.mubr.f32.gmra.mxu1 %v2282_v56 }
 0x291   :  { %v2289_v1 = vadd.f32 %v808_v27, %v268_v9  ;;  %v733_v3 = vadd.f32 %v732_v14, %v2246_v39  ;;  %v809_v4 = vmax.f32 %v731_v8, 0.0 }
 0x292   :  { %v736_v48 = vpop.f32.mrf.mxu0 }
 0x293   :  { %v810_v63 = vmax.f32 %v733_v3, 0.0  ;;  %v737_v49 = vadd.f32 %v736_v48, %v2243_v46  ;;  %1025 = vmatprep.mubr.f32.mxu1 %v2289_v1  ;;  %v2306_v5 = vadd.f32 %v809_v4, %v269_v16 }
 0x294   :  { %v738_v32 = vpop.f32.mrf.mxu0  ;;  %1026 = vmatmul.mubr.f32.gmra.mxu1 %v2294_v62 }
 0x295   :  { %v2301_v7 = vadd.f32 %v810_v63, %v270_v15  ;;  %v739_v9 = vadd.f32 %v738_v32, %v2246_v39  ;;  %v811_v10 = vmax.f32 %v737_v49, 0.0 }
 0x296   :  { %v742_v34 = vpop.f32.mrf.mxu0 }
 0x297   :  { %v812_v33 = vmax.f32 %v739_v9, 0.0  ;;  %v743_v54 = vadd.f32 %v742_v34, %v2243_v46  ;;  %1031 = vmatprep.mubr.f32.mxu1 %v2301_v7  ;;  %v2318_v11 = vadd.f32 %v811_v10, %v271_v22 }
 0x298   :  { %v744_v55 = vpop.f32.mrf.mxu0  ;;  %1032 = vmatmul.mubr.f32.gmra.mxu1 %v2306_v5 }
 0x299   :  { %v2313_v13 = vadd.f32 %v812_v33, %v272_v21  ;;  %v745_v15 = vadd.f32 %v744_v55, %v2246_v39  ;;  %v813_v16 = vmax.f32 %v743_v54, 0.0 }
 0x29a   :  { %v748_v28 = vpop.f32.mrf.mxu0 }
 0x29b   :  { %v814_v59 = vmax.f32 %v745_v15, 0.0  ;;  %v749_v38 = vadd.f32 %v748_v28, %v2243_v46  ;;  %1037 = vmatprep.mubr.f32.mxu1 %v2313_v13  ;;  %v2330_v22 = vadd.f32 %v813_v16, %v2819_v17 }
 0x29c   :  { %v750_v45 = vpop.f32.mrf.mxu0  ;;  %1038 = vmatmul.mubr.f32.gmra.mxu1 %v2318_v11 }
 0x29d   :  { %v2325_v21 = vadd.f32 %v814_v59, %v2818_v19  ;;  %v751_v60 = vadd.f32 %v750_v45, %v2246_v39  ;;  %v815_v61 = vmax.f32 %v749_v38, 0.0 }
 0x29e   :  { %v754_v0 = vpop.f32.mrf.mxu0 }
 0x29f   :  { %v816_v27 = vmax.f32 %v751_v60, 0.0  ;;  %v755_v8 = vadd.f32 %v754_v0, %v2243_v46  ;;  %1043 = vmatprep.mubr.f32.mxu1 %v2325_v21  ;;  %v2342_v48 = vadd.f32 %v815_v61, %v2821_v23 }
 0x2a0   :  { %v756_v14 = vpop.f32.mrf.mxu0  ;;  %1044 = vmatmul.mubr.f32.gmra.mxu1 %v2330_v22 }
 0x2a1   :  { %v2337_v3 = vadd.f32 %v816_v27, %v2820_v25  ;;  %v757_v4 = vadd.f32 %v756_v14, %v2246_v39  ;;  %v817_v63 = vmax.f32 %v755_v8, 0.0 }
 0x2a2   :  { %v760_v49 = vpop.f32.mrf.mxu0 }
 0x2a3   :  { %v818_v32 = vmax.f32 %v757_v4, 0.0  ;;  %v761_v9 = vadd.f32 %v760_v49, %v2243_v46  ;;  %1049 = vmatprep.mubr.f32.mxu1 %v2337_v3  ;;  %v2354_v54 = vadd.f32 %v817_v63, %v2823_v29 }
 0x2a4   :  { %v762_v10 = vpop.f32.mrf.mxu0  ;;  %1050 = vmatmul.mubr.f32.gmra.mxu1 %v2342_v48 }
 0x2a5   :  { %v2349_v34 = vadd.f32 %v818_v32, %v2822_v31  ;;  %v763_v33 = vadd.f32 %v762_v10, %v2246_v39  ;;  %v819_v55 = vmax.f32 %v761_v9, 0.0 }
 0x2a6   :  { %v766_v15 = vpop.f32.mrf.mxu0 }
 0x2a7   :  { %v820_v16 = vmax.f32 %v763_v33, 0.0  ;;  %v767_v28 = vadd.f32 %v766_v15, %v2243_v46  ;;  %1055 = vmatprep.mubr.f32.mxu1 %v2349_v34  ;;  %v2366_v19 = vadd.f32 %v819_v55, %v2825_v35 }
 0x2a8   :  { %v768_v59 = vpop.f32.mrf.mxu0  ;;  %1056 = vmatmul.mubr.f32.gmra.mxu1 %v2354_v54 }
 0x2a9   :  { %v2361_v38 = vadd.f32 %v820_v16, %v2824_v37  ;;  %v769_v45 = vadd.f32 %v768_v59, %v2246_v39  ;;  %v821_v60 = vmax.f32 %v767_v28, 0.0 }
 0x2aa   :  { %v772_v17 = vpop.f32.mrf.mxu0 }
 0x2ab   :  { %v822_v61 = vmax.f32 %v769_v45, 0.0  ;;  %v773_v0 = vadd.f32 %v772_v17, %v2243_v46  ;;  %1061 = vmatprep.mubr.f32.mxu1 %v2361_v38  ;;  %v2378_v25 = vadd.f32 %v821_v60, %v2827_v41 }
 0x2ac   :  { %v774_v27 = vpop.f32.mrf.mxu0  ;;  %1062 = vmatmul.mubr.f32.gmra.mxu1 %v2366_v19 }
 0x2ad   :  { %v2373_v8 = vadd.f32 %v822_v61, %v2826_v43  ;;  %v775_v14 = vadd.f32 %v774_v27, %v2246_v39  ;;  %v823_v4 = vmax.f32 %v773_v0, 0.0 }
 0x2ae   :  { %v778_v23 = vpop.f32.mrf.mxu0 }
 0x2af   :  { %v824_v63 = vmax.f32 %v775_v14, 0.0  ;;  %v779_v49 = vadd.f32 %v778_v23, %v2243_v46  ;;  %1067 = vmatprep.mubr.f32.mxu1 %v2373_v8  ;;  %v2390_v31 = vadd.f32 %v823_v4, %v2829_v51 }
 0x2b0   :  { %v780_v32 = vpop.f32.mrf.mxu0  ;;  %1068 = vmatmul.mubr.f32.gmra.mxu1 %v2378_v25 }
 0x2b1   :  { %v2385_v9 = vadd.f32 %v824_v63, %v2828_v57  ;;  %v781_v10 = vadd.f32 %v780_v32, %v2246_v39  ;;  %v825_v33 = vmax.f32 %v779_v49, 0.0 }
 0x2b2   :  { %v784_v29 = vpop.f32.mrf.mxu0 }
 0x2b3   :  { %v826_v55 = vmax.f32 %v781_v10, 0.0  ;;  %v785_v15 = vadd.f32 %v784_v29, %v2243_v46  ;;  %1073 = vmatprep.mubr.f32.mxu1 %v2385_v9  ;;  %v2402_v37 = vadd.f32 %v825_v33, %v2831_v6  ;;  %v1469_v6 = vld [vmem:[%s2788_s5 + $0xf0] sm:$0xff] }
 0x2b4   :  { %v786_v16 = vpop.f32.mrf.mxu0  ;;  %1074 = vmatmul.mubr.f32.gmra.mxu1 %v2390_v31 }
 0x2b5   :  { %v2397_v28 = vadd.f32 %v826_v55, %v2830_v12  ;;  %v787_v59 = vadd.f32 %v786_v16, %v2246_v39  ;;  %2832 = vst [vmem:[#allocation5_spill] sm:$0xff] %v2402_v37  ;;  %v827_v45 = vmax.f32 %v785_v15, 0.0  ;;  %v1173_v55 = vld [vmem:[#allocation2 + $0x720] sm:$0xff]  ;;  %v1172_v15 = vld [vmem:[#allocation2 + $0x718] sm:$0xff]  ;;  %v1171_v16 = vld [vmem:[#allocation2 + $0x710] sm:$0xff] }
 0x2b6   :  { %v790_v35 = vpop.f32.mrf.mxu0  ;;  %v1169_v12 = vld [vmem:[#allocation2 + $0x700] sm:$0xff] }
 0x2b7   :  { %v828_v60 = vmax.f32 %v787_v59, 0.0  ;;  %v791_v17 = vadd.f32 %v790_v35, %v2243_v46  ;;  %1079 = vmatprep.mubr.f32.mxu1 %v2397_v28  ;;  %v2414_v43 = vadd.f32 %v827_v45, %v2835_v24  ;;  %v1454_v59 = vld [vmem:[%s2788_s5 + $0x78] sm:$0xff]  ;;  %v1453_v45 = vld [vmem:[%s2788_s5 + $0x70] sm:$0xff]  ;;  %v1468_v35 = vld [vmem:[%s2788_s5 + $0xe8] sm:$0xff] }
 0x2b8   :  { %v792_v61 = vpop.f32.mrf.mxu0  ;;  %1080 = vmatmul.mubr.f32.gmra.mxu1 %v2402_v37  ;;  %v2485_v24 = vld [vmem:[%s2788_s5 + $0xd0] sm:$0xff] }
 0x2b9   :  { %v2409_v0 = vadd.f32 %v828_v60, %v2833_v30  ;;  %v793_v27 = vadd.f32 %v792_v61, %v2246_v39  ;;  %2836 = vst [vmem:[#allocation7_spill] sm:$0xff] %v2414_v43  ;;  %v829_v14 = vmax.f32 %v791_v17, 0.0  ;;  %1744 = vmatpush3.msra.mxu1 %v1454_v59  ;;  %v1452_v60 = vld [vmem:[%s2788_s5 + $0x68] sm:$0xff]  ;;  %v2461_v17 = vld [vmem:[%s2788_s5 + $0xe0] sm:$0xff]  ;;  %v2473_v30 = vld [vmem:[%s2788_s5 + $0xd8] sm:$0xff] }
 0x2ba   :  { %v796_v41 = vpop.f32.mrf.mxu0  ;;  %1729 = vmatprep.subr.mxu1 %v1469_v6  ;;  %v2467_v61 = vld [vmem:[%s2788_s5 + $0x60] sm:$0xff] }
 0x2bb   :  { %2834 = vst [vmem:[#allocation6_spill] sm:$0xff] %v2409_v0  ;;  %v830_v4 = vmax.f32 %v793_v27, 0.0  ;;  %v797_v23 = vadd.f32 %v796_v41, %v2243_v46  ;;  %1085 = vmatprep.mubr.f32.mxu1 %v2409_v0  ;;  %v2426_v57 = vadd.f32 %v829_v14, %v2839_v42  ;;  %v2841_v46 = vmax.f32 %v2186_v2, 0.0  ;;  %v1170_v2 = vld [vmem:[#allocation2 + $0x708] sm:$0xff]  ;;  %1745 = vmatpush3.msra.mxu1 %v1453_v45  ;;  %v2479_v27 = vld [vmem:[%s2788_s5 + $0x58] sm:$0xff]  ;;  %v2491_v14 = vld [vmem:[%s2788_s5 + $0x50] sm:$0xff] }
 0x2bc   :  { %v798_v63 = vpop.f32.mrf.mxu0  ;;  %1086 = vmatmul.mubr.f32.gmra.mxu1 %v2414_v43  ;;  %1730 = vmatprep.subr.mxu1 %v1468_v35  ;;  %v2497_v41 = vld [vmem:[%s2788_s5 + $0xc8] sm:$0xff]  ;;  %v2533_v42 = vld [vmem:[%s2788_s5 + $0xb0] sm:$0xff] }
 0x2bd   :  { %v2421_v49 = vadd.f32 %v830_v4, %v2837_v53  ;;  %v799_v32 = vadd.f32 %v798_v63, %v2246_v39  ;;  %2840 = vst [vmem:[#allocation9_spill] sm:$0xff] %v2426_v57  ;;  %v831_v10 = vmax.f32 %v797_v23, 0.0  ;;  %v1174_v39 = vld [vmem:[#allocation2 + $0x728] sm:$0xff]  ;;  %1746 = vmatpush3.msra.mxu1 %v1452_v60  ;;  %v2509_v23 = vld [vmem:[%s2788_s5 + $0xc0] sm:$0xff]  ;;  %v2521_v53 = vld [vmem:[%s2788_s5 + $0xb8] sm:$0xff] }
 0x2be   :  { %1272 = vmatprep.subr.mxu0 %v1174_v39  ;;  %1731 = vmatprep.subr.mxu1 %v2461_v17  ;;  %v2503_v4 = vld [vmem:[%s2788_s5 + $0x48] sm:$0xff]  ;;  %v2515_v63 = vld [vmem:[%s2788_s5 + $0x40] sm:$0xff] }
 0x2bf   :  { %2838 = vst [vmem:[#allocation8_spill] sm:$0xff] %v2421_v49  ;;  %v832_v51 = vmax.f32 %v799_v32, 0.0  ;;  %1091 = vmatprep.mubr.f32.mxu1 %v2421_v49  ;;  %v2436_v29 = vadd.f32 %v831_v10, %v2843_v20  ;;  %1273 = vmatpush2.msra.mxu0 %v1173_v55  ;;  %v2527_v32 = vld [vmem:[%s2788_s5 + $0x38] sm:$0xff]  ;;  %v2539_v10 = vld [vmem:[%s2788_s5 + $0x30] sm:$0xff] }
 0x2c0   :  { %1092 = vmatmul.mubr.f32.gmra.mxu1 %v2426_v57  ;;  %1274 = vmatprep.subr.mxu0 %v1172_v15  ;;  %v1645_v20 = vld [vmem:[%s2787_s4 + $0x2] ss:$4 sm:$0x3] }
 0x2c1   :  { %v2432_v33 = vadd.f32 %v832_v51, %v2841_v46  ;;  %2844 = vst [vmem:[#allocation11_spill] sm:$0xff] %v2436_v29  ;;  %1275 = vmatpush2.msra.mxu0 %v1171_v16  ;;  %1747 = vmatpush3.msra.mxu1 %v2467_v61  ;;  %v2545_v51 = vld [vmem:[%s2788_s5 + $0xa8] sm:$0xff]  ;;  %v2558_v26 = vrot.slane %v1645_v20, %v1993_v44 }
 0x2c2   :  { %1276 = vmatprep.subr.mxu0 %v1170_v2  ;;  %1732 = vmatprep.subr.mxu1 %v2473_v30  ;;  %v2550_v46 = vld [vmem:[%s2788_s5 + $0x28] sm:$0xff]  ;;  %v2561_v39 = vrot.slane %v1645_v20, %v1998_v47 }
 0x2c3   :  { %2842 = vst [vmem:[#allocation10_spill] sm:$0xff] %v2432_v33  ;;  %1097 = vmatprep.mubr.f32.mxu1 %v2432_v33  ;;  %1277 = vmatpush2.msra.mxu0 %v1169_v12 }
 0x2c4   :  { %1098 = vmatmul.mubr.f32.gmra.mxu1 %v2436_v29  ;;  %1648 = vmatprep.subr.mxu0 %v1470_v18 }
 0x2c5   :  { %1748 = vmatpush3.msra.mxu1 %v2479_v27 }
 0x2c6   :  { %1733 = vmatprep.subr.mxu1 %v2485_v24 }
 0x2c7   :  { %1749 = vmatpush3.msra.mxu1 %v2491_v14 }
 0x2c8   :  { %1734 = vmatprep.subr.mxu1 %v2497_v41 }
 0x2c9   :  { %1750 = vmatpush3.msra.mxu1 %v2503_v4 }
 0x2ca   :  { %1735 = vmatprep.subr.mxu1 %v2509_v23 }
 0x2cb   :  { %1751 = vmatpush3.msra.mxu1 %v2515_v63 }
 0x2cc   :  { %1736 = vmatprep.subr.mxu1 %v2521_v53 }
 0x2cd   :  { %1752 = vmatpush3.msra.mxu1 %v2527_v32 }
 0x2ce   :  { %1737 = vmatprep.subr.mxu1 %v2533_v42 }
 0x2cf   :  { %1753 = vmatpush3.msra.mxu1 %v2539_v10 }
 0x2d0   :  { %1738 = vmatprep.subr.mxu1 %v2545_v51 }
 0x2d1   :  { %1754 = vmatpush3.msra.mxu1 %v2550_v46 }
 0x348   :  { %v1009_v55 = vpop.f32.mrf.mxu1 }
 0x349   :  { %v1010_v15 = vadd.f32 %v1009_v55, %v2558_v26 }
 0x34a   :  { %v1011_v16 = vpop.f32.mrf.mxu1 }
 0x34b   :  { %v1012_v2 = vadd.f32 %v1011_v16, %v2561_v39  ;;  %v1104_v29 = vmax.f32 %v1010_v15, 0.0 }
 0x34c   :  { %v1015_v12 = vpop.f32.mrf.mxu1 }
 0x34d   :  { %v1105_v18 = vmax.f32 %v1012_v2, 0.0  ;;  %v1016_v33 = vadd.f32 %v1015_v12, %v2558_v26 }
 0x34e   :  { %v1017_v57 = vpop.f32.mrf.mxu1 }
 0x34f   :  { %v1018_v49 = vadd.f32 %v1017_v57, %v2561_v39  ;;  %1278 = vmatprep.mubr.f32.mxu0 %v1105_v18  ;;  %v1106_v20 = vmax.f32 %v1016_v33, 0.0 }
 0x350   :  { %v1021_v43 = vpop.f32.mrf.mxu1  ;;  %1279 = vmatmul.mubr.f32.vlgmr.msra.gmra.mxu0 %v1104_v29 }
 0x351   :  { %v1107_v0 = vmax.f32 %v1018_v49, 0.0  ;;  %1649 = vmatpush3.msra.mxu0 %v1454_v59  ;;  %v1022_v37 = vadd.f32 %v1021_v43, %v2558_v26 }
 0x352   :  { %v1023_v55 = vpop.f32.mrf.mxu1  ;;  %1650 = vmatprep.subr.mxu0 %v1469_v6 }
 0x353   :  { %v1024_v16 = vadd.f32 %v1023_v55, %v2561_v39  ;;  %1284 = vmatprep.mubr.f32.mxu0 %v1107_v0  ;;  %1651 = vmatpush3.msra.mxu0 %v1453_v45  ;;  %v1108_v57 = vmax.f32 %v1022_v37, 0.0 }
 0x354   :  { %v1027_v15 = vpop.f32.mrf.mxu1  ;;  %1285 = vmatmul.mubr.f32.gmra.mxu0 %v1106_v20  ;;  %1652 = vmatprep.subr.mxu0 %v1468_v35 }
 0x355   :  { %v1109_v2 = vmax.f32 %v1024_v16, 0.0  ;;  %1653 = vmatpush3.msra.mxu0 %v1452_v60  ;;  %v1028_v12 = vadd.f32 %v1027_v15, %v2558_v26 }
 0x356   :  { %v1029_v29 = vpop.f32.mrf.mxu1  ;;  %1654 = vmatprep.subr.mxu0 %v2461_v17 }
 0x357   :  { %v1030_v49 = vadd.f32 %v1029_v29, %v2561_v39  ;;  %1290 = vmatprep.mubr.f32.mxu0 %v1109_v2  ;;  %1655 = vmatpush3.msra.mxu0 %v2467_v61  ;;  %v1110_v33 = vmax.f32 %v1028_v12, 0.0 }
 0x358   :  { %v1033_v43 = vpop.f32.mrf.mxu1  ;;  %1291 = vmatmul.mubr.f32.gmra.mxu0 %v1108_v57  ;;  %1656 = vmatprep.subr.mxu0 %v2473_v30 }
 0x359   :  { %v1111_v0 = vmax.f32 %v1030_v49, 0.0  ;;  %1657 = vmatpush3.msra.mxu0 %v2479_v27  ;;  %v1034_v37 = vadd.f32 %v1033_v43, %v2558_v26 }
 0x35a   :  { %v1035_v59 = vpop.f32.mrf.mxu1  ;;  %1658 = vmatprep.subr.mxu0 %v2485_v24 }
 0x35b   :  { %v1036_v6 = vadd.f32 %v1035_v59, %v2561_v39  ;;  %1296 = vmatprep.mubr.f32.mxu0 %v1111_v0  ;;  %1659 = vmatpush3.msra.mxu0 %v2491_v14  ;;  %v1112_v60 = vmax.f32 %v1034_v37, 0.0 }
 0x35c   :  { %v1039_v45 = vpop.f32.mrf.mxu1  ;;  %1297 = vmatmul.mubr.f32.gmra.mxu0 %v1110_v33  ;;  %1660 = vmatprep.subr.mxu0 %v2497_v41 }
 0x35d   :  { %v1113_v35 = vmax.f32 %v1036_v6, 0.0  ;;  %1661 = vmatpush3.msra.mxu0 %v2503_v4  ;;  %v1040_v17 = vadd.f32 %v1039_v45, %v2558_v26 }
 0x35e   :  { %v1041_v61 = vpop.f32.mrf.mxu1  ;;  %1662 = vmatprep.subr.mxu0 %v2509_v23 }
 0x35f   :  { %v1042_v30 = vadd.f32 %v1041_v61, %v2561_v39  ;;  %1302 = vmatprep.mubr.f32.mxu0 %v1113_v35  ;;  %1663 = vmatpush3.msra.mxu0 %v2515_v63  ;;  %v1114_v14 = vmax.f32 %v1040_v17, 0.0 }
 0x360   :  { %v1045_v27 = vpop.f32.mrf.mxu1  ;;  %1303 = vmatmul.mubr.f32.gmra.mxu0 %v1112_v60  ;;  %1664 = vmatprep.subr.mxu0 %v2521_v53 }
 0x361   :  { %v1115_v24 = vmax.f32 %v1042_v30, 0.0  ;;  %1665 = vmatpush3.msra.mxu0 %v2527_v32  ;;  %v1046_v41 = vadd.f32 %v1045_v27, %v2558_v26 }
 0x362   :  { %v1047_v4 = vpop.f32.mrf.mxu1  ;;  %1666 = vmatprep.subr.mxu0 %v2533_v42 }
 0x363   :  { %v1048_v23 = vadd.f32 %v1047_v4, %v2561_v39  ;;  %1308 = vmatprep.mubr.f32.mxu0 %v1115_v24  ;;  %1667 = vmatpush3.msra.mxu0 %v2539_v10  ;;  %v1116_v53 = vmax.f32 %v1046_v41, 0.0 }
 0x364   :  { %v1051_v18 = vpop.f32.mrf.mxu1  ;;  %1309 = vmatmul.mubr.f32.gmra.mxu0 %v1114_v14  ;;  %1668 = vmatprep.subr.mxu0 %v2545_v51 }
 0x365   :  { %v1117_v63 = vmax.f32 %v1048_v23, 0.0  ;;  %1669 = vmatpush3.msra.mxu0 %v2550_v46  ;;  %v1052_v32 = vadd.f32 %v1051_v18, %v2558_v26 }
 0x366   :  { %v1053_v20 = vpop.f32.mrf.mxu1 }
 0x367   :  { %v1054_v55 = vadd.f32 %v1053_v20, %v2561_v39  ;;  %1314 = vmatprep.mubr.f32.mxu0 %v1117_v63  ;;  %v1118_v15 = vmax.f32 %v1052_v32, 0.0 }
 0x368   :  { %v1057_v42 = vpop.f32.mrf.mxu1  ;;  %1315 = vmatmul.mubr.f32.gmra.mxu0 %v1116_v53 }
 0x369   :  { %v1119_v16 = vmax.f32 %v1054_v55, 0.0  ;;  %v1058_v10 = vadd.f32 %v1057_v42, %v2558_v26 }
 0x36a   :  { %v1059_v2 = vpop.f32.mrf.mxu1 }
 0x36b   :  { %v1060_v57 = vadd.f32 %v1059_v2, %v2561_v39  ;;  %1320 = vmatprep.mubr.f32.mxu0 %v1119_v16  ;;  %v1120_v12 = vmax.f32 %v1058_v10, 0.0 }
 0x36c   :  { %v1063_v51 = vpop.f32.mrf.mxu1  ;;  %1321 = vmatmul.mubr.f32.gmra.mxu0 %v1118_v15 }
 0x36d   :  { %v1121_v46 = vmax.f32 %v1060_v57, 0.0  ;;  %v1064_v29 = vadd.f32 %v1063_v51, %v2558_v26 }
 0x36e   :  { %v1065_v49 = vpop.f32.mrf.mxu1 }
 0x36f   :  { %v1066_v43 = vadd.f32 %v1065_v49, %v2561_v39  ;;  %1326 = vmatprep.mubr.f32.mxu0 %v1121_v46  ;;  %v1122_v37 = vmax.f32 %v1064_v29, 0.0 }
 0x370   :  { %v1069_v0 = vpop.f32.mrf.mxu1  ;;  %1327 = vmatmul.mubr.f32.gmra.mxu0 %v1120_v12 }
 0x371   :  { %v1123_v33 = vmax.f32 %v1066_v43, 0.0  ;;  %v1070_v59 = vadd.f32 %v1069_v0, %v2558_v26 }
 0x372   :  { %v1071_v6 = vpop.f32.mrf.mxu1 }
 0x373   :  { %v1072_v45 = vadd.f32 %v1071_v6, %v2561_v39  ;;  %1332 = vmatprep.mubr.f32.mxu0 %v1123_v33  ;;  %v1124_v17 = vmax.f32 %v1070_v59, 0.0  ;;  %v1459_v59 = vld [vmem:[%s2788_s5 + $0xa0] sm:$0xff] }
 0x374   :  { %v1075_v35 = vpop.f32.mrf.mxu1  ;;  %1333 = vmatmul.mubr.f32.gmra.mxu0 %v1122_v37  ;;  %1670 = vmatprep.subr.mxu0 %v1459_v59  ;;  %v1443_v6 = vld [vmem:[%s2788_s5 + $0x20] sm:$0xff] }
 0x375   :  { %v1125_v60 = vmax.f32 %v1072_v45, 0.0  ;;  %v1076_v61 = vadd.f32 %v1075_v35, %v2558_v26  ;;  %1739 = vmatprep.subr.mxu1 %v1459_v59  ;;  %1671 = vmatpush3.msra.mxu0 %v1443_v6  ;;  %v1457_v45 = vld [vmem:[%s2788_s5 + $0x90] sm:$0xff] }
 0x376   :  { %v1077_v30 = vpop.f32.mrf.mxu1  ;;  %1755 = vmatpush3.msra.mxu1 %v1443_v6  ;;  %v1441_v35 = vld [vmem:[%s2788_s5 + $0x10] sm:$0xff] }
 0x377   :  { %v1078_v27 = vadd.f32 %v1077_v30, %v2561_v39  ;;  %1338 = vmatprep.mubr.f32.mxu0 %v1125_v60  ;;  %v1126_v41 = vmax.f32 %v1076_v61, 0.0  ;;  %v1456_v60 = vld [vmem:[%s2788_s5 + $0x88] sm:$0xff]  ;;  %v1455_v61 = vld [vmem:[%s2788_s5 + $0x80] sm:$0xff] }
 0x378   :  { %v1081_v24 = vpop.f32.mrf.mxu1  ;;  %1339 = vmatmul.mubr.f32.gmra.mxu0 %v1124_v17  ;;  %v1440_v17 = vld [vmem:[%s2788_s5 + $0x8] sm:$0xff]  ;;  %v1439_v30 = vld [vmem:[%s2788_s5] sm:$0xff] }
 0x379   :  { %v1127_v14 = vmax.f32 %v1078_v27, 0.0  ;;  %v1082_v4 = vadd.f32 %v1081_v24, %v2558_v26  ;;  %v1646_v27 = vld [vmem:[%s2787_s4 + $0x3] ss:$4 sm:$0x3] }
 0x37a   :  { %v1083_v23 = vpop.f32.mrf.mxu1  ;;  %v2645_v24 = vrot.slane %v1646_v27, %v1993_v44 }
 0x37b   :  { %v1084_v18 = vadd.f32 %v1083_v23, %v2561_v39  ;;  %1344 = vmatprep.mubr.f32.mxu0 %v1127_v14  ;;  %v1128_v32 = vmax.f32 %v1082_v4, 0.0  ;;  %v2648_v14 = vrot.slane %v1646_v27, %v1998_v47 }
 0x37c   :  { %v1087_v63 = vpop.f32.mrf.mxu1  ;;  %1345 = vmatmul.mubr.f32.gmra.mxu0 %v1126_v41 }
 0x37d   :  { %v1129_v53 = vmax.f32 %v1084_v18, 0.0  ;;  %v1088_v20 = vadd.f32 %v1087_v63, %v2558_v26 }
 0x37e   :  { %v1089_v55 = vpop.f32.mrf.mxu1 }
 0x37f   :  { %v1090_v42 = vadd.f32 %v1089_v55, %v2561_v39  ;;  %1350 = vmatprep.mubr.f32.mxu0 %v1129_v53  ;;  %v1130_v10 = vmax.f32 %v1088_v20, 0.0 }
 0x380   :  { %v1093_v16 = vpop.f32.mrf.mxu1  ;;  %1351 = vmatmul.mubr.f32.gmra.mxu0 %v1128_v32 }
 0x381   :  { %v1131_v15 = vmax.f32 %v1090_v42, 0.0  ;;  %v1094_v2 = vadd.f32 %v1093_v16, %v2558_v26 }
 0x382   :  { %v1095_v57 = vpop.f32.mrf.mxu1 }
 0x383   :  { %v1096_v51 = vadd.f32 %v1095_v57, %v2561_v39  ;;  %1356 = vmatprep.mubr.f32.mxu0 %v1131_v15  ;;  %v1132_v29 = vmax.f32 %v1094_v2, 0.0 }
 0x384   :  { %v1099_v46 = vpop.f32.mrf.mxu1  ;;  %1357 = vmatmul.mubr.f32.gmra.mxu0 %v1130_v10 }
 0x385   :  { %v1133_v12 = vmax.f32 %v1096_v51, 0.0  ;;  %v1100_v49 = vadd.f32 %v1099_v46, %v2558_v26  ;;  %v1458_v26 = vld [vmem:[%s2788_s5 + $0x98] sm:$0xff] }
 0x386   :  { %v1101_v43 = vpop.f32.mrf.mxu1  ;;  %1672 = vmatprep.subr.mxu0 %v1458_v26  ;;  %1740 = vmatprep.subr.mxu1 %v1458_v26 }
 0x387   :  { %v1102_v0 = vadd.f32 %v1101_v43, %v2561_v39  ;;  %1362 = vmatprep.mubr.f32.mxu0 %v1133_v12  ;;  %v1134_v37 = vmax.f32 %v1100_v49, 0.0  ;;  %v1442_v39 = vld [vmem:[%s2788_s5 + $0x18] sm:$0xff] }
 0x388   :  { %1363 = vmatmul.mubr.f32.gmra.mxu0 %v1132_v29  ;;  %1756 = vmatpush3.msra.mxu1 %v1442_v39 }
 0x389   :  { %v1135_v33 = vmax.f32 %v1102_v0, 0.0  ;;  %1673 = vmatpush3.msra.mxu0 %v1442_v39  ;;  %1741 = vmatprep.subr.mxu1 %v1457_v45 }
 0x38a   :  { %1674 = vmatprep.subr.mxu0 %v1457_v45  ;;  %1757 = vmatpush3.msra.mxu1 %v1441_v35 }
 0x38b   :  { %1368 = vmatprep.mubr.f32.mxu0 %v1135_v33  ;;  %1675 = vmatpush3.msra.mxu0 %v1441_v35 }
 0x38c   :  { %1369 = vmatmul.mubr.f32.gmra.mxu0 %v1134_v37  ;;  %1676 = vmatprep.subr.mxu0 %v1456_v60 }
 0x38d   :  { %1742 = vmatprep.subr.mxu1 %v1456_v60  ;;  %1677 = vmatpush3.msra.mxu0 %v1440_v17 }
 0x38e   :  { %1758 = vmatpush3.msra.mxu1 %v1440_v17  ;;  %1678 = vmatprep.subr.mxu0 %v1455_v61 }
 0x38f   :  { %1743 = vmatprep.subr.mxu1 %v1455_v61  ;;  %1679 = vmatpush3.msra.mxu0 %v1439_v30 }
 0x390   :  { %1759 = vmatpush3.msra.mxu1 %v1439_v30 }
 0x410   :  { %v1280_v41 = vpop.f32.mrf.mxu0 }
 0x411   :  { %v1281_v4 = vadd.f32 %v1280_v41, %v2645_v24 }
 0x412   :  { %v1282_v23 = vpop.f32.mrf.mxu0 }
 0x413   :  { %v1283_v18 = vadd.f32 %v1282_v23, %v2648_v14  ;;  %v1375_v63 = vmax.f32 %v1281_v4, 0.0 }
 0x414   :  { %v1286_v53 = vpop.f32.mrf.mxu0 }
 0x415   :  { %v1376_v32 = vmax.f32 %v1283_v18, 0.0  ;;  %v1287_v20 = vadd.f32 %v1286_v53, %v2645_v24  ;;  %v1407_v16 = vadd.f32 %v1375_v63, %v2258_v36 }
 0x416   :  { %v1288_v55 = vpop.f32.mrf.mxu0 }
 0x417   :  { %v1408_v42 = vadd.f32 %v1376_v32, %v2253_v40  ;;  %v1289_v44 = vadd.f32 %v1288_v55, %v2648_v14  ;;  %v1377_v47 = vmax.f32 %v1287_v20, 0.0 }
 0x418   :  { %v1292_v15 = vpop.f32.mrf.mxu0 }
 0x419   :  { %v1378_v10 = vmax.f32 %v1289_v44, 0.0  ;;  %v1293_v2 = vadd.f32 %v1292_v15, %v2645_v24  ;;  %1542 = vmatprep.mubr.f32.mxu0 %v1408_v42  ;;  %v1409_v12 = vadd.f32 %v1377_v47, %v2270_v50 }
 0x41a   :  { %v1294_v57 = vpop.f32.mrf.mxu0  ;;  %1543 = vmatmul.mubr.f32.vlgmr.msra.gmra.mxu0 %v1407_v16 }
 0x41b   :  { %v1410_v51 = vadd.f32 %v1378_v10, %v2265_v52  ;;  %v1295_v46 = vadd.f32 %v1294_v57, %v2648_v14  ;;  %v1379_v29 = vmax.f32 %v1293_v2, 0.0 }
 0x41c   :  { %v1298_v40 = vpop.f32.mrf.mxu0 }
 0x41d   :  { %v1380_v49 = vmax.f32 %v1295_v46, 0.0  ;;  %v1299_v43 = vadd.f32 %v1298_v40, %v2645_v24  ;;  %1547 = vmatprep.mubr.f32.mxu0 %v1410_v51  ;;  %v1411_v37 = vadd.f32 %v1379_v29, %v2282_v56 }
 0x41e   :  { %v1300_v36 = vpop.f32.mrf.mxu0  ;;  %1548 = vmatmul.mubr.f32.gmra.mxu0 %v1409_v12 }
 0x41f   :  { %v1412_v0 = vadd.f32 %v1380_v49, %v2277_v58  ;;  %v1301_v33 = vadd.f32 %v1300_v36, %v2648_v14  ;;  %v1381_v59 = vmax.f32 %v1299_v43, 0.0 }
 0x420   :  { %v1304_v52 = vpop.f32.mrf.mxu0 }
 0x421   :  { %v1382_v6 = vmax.f32 %v1301_v33, 0.0  ;;  %v1305_v26 = vadd.f32 %v1304_v52, %v2645_v24  ;;  %1552 = vmatprep.mubr.f32.mxu0 %v1412_v0  ;;  %v1413_v35 = vadd.f32 %v1381_v59, %v2294_v62 }
 0x422   :  { %v1306_v50 = vpop.f32.mrf.mxu0  ;;  %1553 = vmatmul.mubr.f32.gmra.mxu0 %v1411_v37 }
 0x423   :  { %v1414_v39 = vadd.f32 %v1382_v6, %v2289_v1  ;;  %v1307_v45 = vadd.f32 %v1306_v50, %v2648_v14  ;;  %v1383_v60 = vmax.f32 %v1305_v26, 0.0 }
 0x424   :  { %v1310_v58 = vpop.f32.mrf.mxu0 }
 0x425   :  { %v1384_v17 = vmax.f32 %v1307_v45, 0.0  ;;  %v1311_v61 = vadd.f32 %v1310_v58, %v2645_v24  ;;  %1557 = vmatprep.mubr.f32.mxu0 %v1414_v39  ;;  %v1415_v41 = vadd.f32 %v1383_v60, %v2306_v5 }
 0x426   :  { %v1312_v56 = vpop.f32.mrf.mxu0  ;;  %1558 = vmatmul.mubr.f32.gmra.mxu0 %v1413_v35 }
 0x427   :  { %v1416_v30 = vadd.f32 %v1384_v17, %v2301_v7  ;;  %v1313_v27 = vadd.f32 %v1312_v56, %v2648_v14  ;;  %v1385_v4 = vmax.f32 %v1311_v61, 0.0 }
 0x428   :  { %v1316_v1 = vpop.f32.mrf.mxu0 }
 0x429   :  { %v1386_v23 = vmax.f32 %v1313_v27, 0.0  ;;  %v1317_v18 = vadd.f32 %v1316_v1, %v2645_v24  ;;  %1562 = vmatprep.mubr.f32.mxu1 %v1416_v30  ;;  %v1417_v32 = vadd.f32 %v1385_v4, %v2318_v11 }
 0x42a   :  { %v1318_v62 = vpop.f32.mrf.mxu0  ;;  %1563 = vmatmul.mubr.f32.vlgmr.msra.gmra.mxu1 %v1415_v41 }
 0x42b   :  { %v1418_v63 = vadd.f32 %v1386_v23, %v2313_v13  ;;  %v1319_v53 = vadd.f32 %v1318_v62, %v2648_v14  ;;  %v1387_v20 = vmax.f32 %v1317_v18, 0.0  ;;  %v2845_v62 = vld [vmem:[#allocation5_spill] sm:$0xff] }
 0x42c   :  { %v1322_v7 = vpop.f32.mrf.mxu0 }
 0x42d   :  { %v1388_v55 = vmax.f32 %v1319_v53, 0.0  ;;  %v1323_v42 = vadd.f32 %v1322_v7, %v2645_v24  ;;  %1567 = vmatprep.mubr.f32.mxu1 %v1418_v63  ;;  %v1419_v47 = vadd.f32 %v1387_v20, %v2330_v22  ;;  %v2846_v7 = vld [vmem:[#allocation6_spill] sm:$0xff] }
 0x42e   :  { %v1324_v5 = vpop.f32.mrf.mxu0  ;;  %1568 = vmatmul.mubr.f32.gmra.mxu1 %v1417_v32 }
 0x42f   :  { %v1420_v44 = vadd.f32 %v1388_v55, %v2325_v21  ;;  %v1325_v16 = vadd.f32 %v1324_v5, %v2648_v14  ;;  %v1389_v15 = vmax.f32 %v1323_v42, 0.0  ;;  %v2847_v5 = vld [vmem:[#allocation7_spill] sm:$0xff] }
 0x430   :  { %v1328_v13 = vpop.f32.mrf.mxu0 }
 0x431   :  { %v1390_v10 = vmax.f32 %v1325_v16, 0.0  ;;  %v1329_v2 = vadd.f32 %v1328_v13, %v2645_v24  ;;  %1572 = vmatprep.mubr.f32.mxu1 %v1420_v44  ;;  %v1421_v46 = vadd.f32 %v1389_v15, %v2342_v48 }
 0x432   :  { %v1330_v11 = vpop.f32.mrf.mxu0  ;;  %1573 = vmatmul.mubr.f32.gmra.mxu1 %v1419_v47 }
 0x433   :  { %v1422_v57 = vadd.f32 %v1390_v10, %v2337_v3  ;;  %v1331_v51 = vadd.f32 %v1330_v11, %v2648_v14  ;;  %v1391_v12 = vmax.f32 %v1329_v2, 0.0  ;;  %v2848_v10 = vld [vmem:[#allocation8_spill] sm:$0xff] }
 0x434   :  { %v1334_v21 = vpop.f32.mrf.mxu0 }
 0x435   :  { %v1392_v29 = vmax.f32 %v1331_v51, 0.0  ;;  %v1335_v40 = vadd.f32 %v1334_v21, %v2645_v24  ;;  %1577 = vmatprep.mubr.f32.mxu1 %v1422_v57  ;;  %v1423_v36 = vadd.f32 %v1391_v12, %v2354_v54  ;;  %v2849_v57 = vld [vmem:[#allocation9_spill] sm:$0xff]  ;;  %v2850_v21 = vld [vmem:[#allocation10_spill] sm:$0xff] }
 0x436   :  { %v1336_v22 = vpop.f32.mrf.mxu0  ;;  %1578 = vmatmul.mubr.f32.gmra.mxu1 %v1421_v46 }
 0x437   :  { %v1424_v49 = vadd.f32 %v1392_v29, %v2349_v34  ;;  %v1337_v43 = vadd.f32 %v1336_v22, %v2648_v14  ;;  %v1393_v0 = vmax.f32 %v1335_v40, 0.0  ;;  %v2851_v40 = vld [vmem:[#allocation11_spill] sm:$0xff] }
 0x438   :  { %v1340_v3 = vpop.f32.mrf.mxu0 }
 0x439   :  { %v1394_v33 = vmax.f32 %v1337_v43, 0.0  ;;  %v1341_v37 = vadd.f32 %v1340_v3, %v2645_v24  ;;  %1582 = vmatprep.mubr.f32.mxu1 %v1424_v49  ;;  %v1425_v6 = vadd.f32 %v1393_v0, %v2366_v19  ;;  %v2717_v49 = vld [vmem:[%s2789_s6] ss:$0 sm:$0xff] }
 0x43a   :  { %v1342_v48 = vpop.f32.mrf.mxu0  ;;  %1583 = vmatmul.mubr.f32.gmra.mxu1 %v1423_v36 }
 0x43b   :  { %v1426_v59 = vadd.f32 %v1394_v33, %v2361_v38  ;;  %v1343_v52 = vadd.f32 %v1342_v48, %v2648_v14  ;;  %v1395_v26 = vmax.f32 %v1341_v37, 0.0 }
 0x43c   :  { %v1346_v34 = vpop.f32.mrf.mxu0 }
 0x43d   :  { %v1396_v50 = vmax.f32 %v1343_v52, 0.0  ;;  %v1347_v39 = vadd.f32 %v1346_v34, %v2645_v24  ;;  %1587 = vmatprep.mubr.f32.mxu1 %v1426_v59  ;;  %v1427_v60 = vadd.f32 %v1395_v26, %v2378_v25 }
 0x43e   :  { %v1348_v54 = vpop.f32.mrf.mxu0  ;;  %1588 = vmatmul.mubr.f32.gmra.mxu1 %v1425_v6 }
 0x43f   :  { %v1428_v45 = vadd.f32 %v1396_v50, %v2373_v8  ;;  %v1349_v35 = vadd.f32 %v1348_v54, %v2648_v14  ;;  %v1397_v58 = vmax.f32 %v1347_v39, 0.0 }
 0x440   :  { %v1352_v38 = vpop.f32.mrf.mxu0 }
 0x441   :  { %v1398_v17 = vmax.f32 %v1349_v35, 0.0  ;;  %v1353_v61 = vadd.f32 %v1352_v38, %v2645_v24  ;;  %1592 = vmatprep.mubr.f32.mxu1 %v1428_v45  ;;  %v1429_v27 = vadd.f32 %v1397_v58, %v2390_v31 }
 0x442   :  { %v1354_v19 = vpop.f32.mrf.mxu0  ;;  %1593 = vmatmul.mubr.f32.gmra.mxu1 %v1427_v60 }
 0x443   :  { %v1430_v56 = vadd.f32 %v1398_v17, %v2385_v9  ;;  %v1355_v30 = vadd.f32 %v1354_v19, %v2648_v14  ;;  %v1399_v41 = vmax.f32 %v1353_v61, 0.0 }
 0x444   :  { %v1358_v8 = vpop.f32.mrf.mxu0 }
 0x445   :  { %v1400_v4 = vmax.f32 %v1355_v30, 0.0  ;;  %v1359_v1 = vadd.f32 %v1358_v8, %v2645_v24  ;;  %1597 = vmatprep.mubr.f32.mxu1 %v1430_v56  ;;  %v1431_v63 = vadd.f32 %v1399_v41, %v2845_v62 }
 0x446   :  { %v1360_v25 = vpop.f32.mrf.mxu0  ;;  %1598 = vmatmul.mubr.f32.gmra.mxu1 %v1429_v27 }
 0x447   :  { %v1432_v23 = vadd.f32 %v1400_v4, %v2397_v28  ;;  %v1361_v18 = vadd.f32 %v1360_v25, %v2648_v14  ;;  %v1401_v53 = vmax.f32 %v1359_v1, 0.0 }
 0x448   :  { %v1364_v9 = vpop.f32.mrf.mxu0 }
 0x449   :  { %v1402_v32 = vmax.f32 %v1361_v18, 0.0  ;;  %v1365_v20 = vadd.f32 %v1364_v9, %v2645_v24  ;;  %1602 = vmatprep.mubr.f32.mxu1 %v1432_v23  ;;  %v1433_v44 = vadd.f32 %v1401_v53, %v2847_v5 }
 0x44a   :  { %v1366_v31 = vpop.f32.mrf.mxu0  ;;  %1603 = vmatmul.mubr.f32.gmra.mxu1 %v1431_v63 }
 0x44b   :  { %v1434_v55 = vadd.f32 %v1402_v32, %v2846_v7  ;;  %v1367_v42 = vadd.f32 %v1366_v31, %v2648_v14  ;;  %v1403_v16 = vmax.f32 %v1365_v20, 0.0 }
 0x44c   :  { %v1370_v28 = vpop.f32.mrf.mxu0 }
 0x44d   :  { %v1404_v47 = vmax.f32 %v1367_v42, 0.0  ;;  %v1371_v15 = vadd.f32 %v1370_v28, %v2645_v24  ;;  %1607 = vmatprep.mubr.f32.mxu1 %v1434_v55  ;;  %v1435_v51 = vadd.f32 %v1403_v16, %v2849_v57 }
 0x44e   :  { %v1372_v13 = vpop.f32.mrf.mxu0  ;;  %1608 = vmatmul.mubr.f32.gmra.mxu1 %v1433_v44 }
 0x44f   :  { %v1436_v2 = vadd.f32 %v1404_v47, %v2848_v10  ;;  %v1373_v11 = vadd.f32 %v1372_v13, %v2648_v14  ;;  %v1405_v46 = vmax.f32 %v1371_v15, 0.0 }
 0x451   :  { %v1406_v12 = vmax.f32 %v1373_v11, 0.0  ;;  %1612 = vmatprep.mubr.f32.mxu1 %v1436_v2  ;;  %v1437_v22 = vadd.f32 %v1405_v46, %v2851_v40 }
 0x452   :  { %1613 = vmatmul.mubr.f32.gmra.mxu1 %v1435_v51 }
 0x453   :  { %v1438_v29 = vadd.f32 %v1406_v12, %v2850_v21 }
 0x455   :  { %1617 = vmatprep.mubr.f32.mxu1 %v1438_v29 }
 0x456   :  { %1618 = vmatmul.mubr.f32.gmra.mxu1 %v1437_v22 }
 0x4da   :  { %v1680_v24 = vpop.f32.mrf.mxu0 }
 0x4dc   :  { %v1681_v43 = vpop.f32.mrf.mxu0 }
 0x4dd   :  { %v1682_v14 = vadd.f32 %v1681_v43, %v1680_v24 }
 0x4de   :  { %v1683_v36 = vpop.f32.mrf.mxu0 }
 0x4df   :  { %v1545_v0 = vadd.f32 %v1682_v14, %v2717_v49 }
 0x4e0   :  { %v1684_v3 = vpop.f32.mrf.mxu0 }
 0x4e1   :  { %1623 = vst [vmem:[%s2790_s7] sm:$0xff] %v1545_v0  ;;  %v1685_v33 = vadd.f32 %v1684_v3, %v1683_v36 }
 0x4e2   :  { %v1686_v37 = vpop.f32.mrf.mxu0 }
 0x4e3   :  { %v1550_v48 = vadd.f32 %v1685_v33, %v2717_v49 }
 0x4e4   :  { %v1687_v59 = vpop.f32.mrf.mxu0 }
 0x4e5   :  { %1624 = vst [vmem:[%s2790_s7 + $0x8] sm:$0xff] %v1550_v48  ;;  %v1688_v52 = vadd.f32 %v1687_v59, %v1686_v37 }
 0x4e6   :  { %v1689_v6 = vpop.f32.mrf.mxu0 }
 0x4e7   :  { %v1555_v26 = vadd.f32 %v1688_v52, %v2717_v49 }
 0x4e8   :  { %v1690_v34 = vpop.f32.mrf.mxu0 }
 0x4e9   :  { %1625 = vst [vmem:[%s2790_s7 + $0x10] sm:$0xff] %v1555_v26  ;;  %v1691_v50 = vadd.f32 %v1690_v34, %v1689_v6 }
 0x4ea   :  { %v1692_v39 = vpop.f32.mrf.mxu1 }
 0x4eb   :  { %v1560_v54 = vadd.f32 %v1691_v50, %v2717_v49 }
 0x4ec   :  { %v1693_v45 = vpop.f32.mrf.mxu1 }
 0x4ed   :  { %1626 = vst [vmem:[%s2790_s7 + $0x18] sm:$0xff] %v1560_v54  ;;  %v1694_v35 = vadd.f32 %v1693_v45, %v1692_v39 }
 0x4ee   :  { %v1695_v60 = vpop.f32.mrf.mxu1 }
 0x4ef   :  { %v1565_v58 = vadd.f32 %v1694_v35, %v2717_v49 }
 0x4f0   :  { %v1696_v38 = vpop.f32.mrf.mxu1 }
 0x4f1   :  { %1627 = vst [vmem:[%s2790_s7 + $0x20] sm:$0xff] %v1565_v58  ;;  %v1697_v17 = vadd.f32 %v1696_v38, %v1695_v60 }
 0x4f2   :  { %v1698_v61 = vpop.f32.mrf.mxu1 }
 0x4f3   :  { %v1570_v19 = vadd.f32 %v1697_v17, %v2717_v49 }
 0x4f4   :  { %v1699_v56 = vpop.f32.mrf.mxu1 }
 0x4f5   :  { %1628 = vst [vmem:[%s2790_s7 + $0x28] sm:$0xff] %v1570_v19  ;;  %v1700_v30 = vadd.f32 %v1699_v56, %v1698_v61 }
 0x4f6   :  { %v1701_v27 = vpop.f32.mrf.mxu1 }
 0x4f7   :  { %v1575_v41 = vadd.f32 %v1700_v30, %v2717_v49 }
 0x4f8   :  { %v1702_v8 = vpop.f32.mrf.mxu1 }
 0x4f9   :  { %1629 = vst [vmem:[%s2790_s7 + $0x30] sm:$0xff] %v1575_v41  ;;  %v1703_v4 = vadd.f32 %v1702_v8, %v1701_v27 }
 0x4fa   :  { %v1704_v1 = vpop.f32.mrf.mxu1 }
 0x4fb   :  { %v1580_v25 = vadd.f32 %v1703_v4, %v2717_v49 }
 0x4fc   :  { %v1705_v23 = vpop.f32.mrf.mxu1 }
 0x4fd   :  { %1630 = vst [vmem:[%s2790_s7 + $0x38] sm:$0xff] %v1580_v25  ;;  %v1706_v18 = vadd.f32 %v1705_v23, %v1704_v1 }
 0x4fe   :  { %v1707_v62 = vpop.f32.mrf.mxu1 }
 0x4ff   :  { %v1585_v63 = vadd.f32 %v1706_v18, %v2717_v49 }
 0x500   :  { %v1708_v53 = vpop.f32.mrf.mxu1 }
 0x501   :  { %1631 = vst [vmem:[%s2790_s7 + $0x40] sm:$0xff] %v1585_v63  ;;  %v1709_v9 = vadd.f32 %v1708_v53, %v1707_v62 }
 0x502   :  { %v1710_v32 = vpop.f32.mrf.mxu1 }
 0x503   :  { %v1590_v20 = vadd.f32 %v1709_v9, %v2717_v49 }
 0x504   :  { %v1711_v31 = vpop.f32.mrf.mxu1 }
 0x505   :  { %1632 = vst [vmem:[%s2790_s7 + $0x48] sm:$0xff] %v1590_v20  ;;  %v1712_v7 = vadd.f32 %v1711_v31, %v1710_v32 }
 0x506   :  { %v1713_v55 = vpop.f32.mrf.mxu1 }
 0x507   :  { %v1595_v42 = vadd.f32 %v1712_v7, %v2717_v49 }
 0x508   :  { %v1714_v5 = vpop.f32.mrf.mxu1 }
 0x509   :  { %1633 = vst [vmem:[%s2790_s7 + $0x50] sm:$0xff] %v1595_v42  ;;  %v1715_v44 = vadd.f32 %v1714_v5, %v1713_v55 }
 0x50a   :  { %v1716_v16 = vpop.f32.mrf.mxu1 }
 0x50b   :  { %v1600_v28 = vadd.f32 %v1715_v44, %v2717_v49 }
 0x50c   :  { %v1717_v47 = vpop.f32.mrf.mxu1 }
 0x50d   :  { %1634 = vst [vmem:[%s2790_s7 + $0x58] sm:$0xff] %v1600_v28  ;;  %v1718_v15 = vadd.f32 %v1717_v47, %v1716_v16 }
 0x50e   :  { %v1719_v13 = vpop.f32.mrf.mxu1 }
 0x50f   :  { %v1605_v10 = vadd.f32 %v1718_v15, %v2717_v49 }
 0x510   :  { %v1720_v2 = vpop.f32.mrf.mxu1 }
 0x511   :  { %1635 = vst [vmem:[%s2790_s7 + $0x60] sm:$0xff] %v1605_v10  ;;  %v1721_v11 = vadd.f32 %v1720_v2, %v1719_v13 }
 0x512   :  { %v1722_v57 = vpop.f32.mrf.mxu1 }
 0x513   :  { %v1610_v51 = vadd.f32 %v1721_v11, %v2717_v49 }
 0x514   :  { %v1723_v46 = vpop.f32.mrf.mxu1 }
 0x515   :  { %1636 = vst [vmem:[%s2790_s7 + $0x68] sm:$0xff] %v1610_v51  ;;  %v1724_v12 = vadd.f32 %v1723_v46, %v1722_v57 }
 0x516   :  { %v1725_v21 = vpop.f32.mrf.mxu1 }
 0x517   :  { %v1615_v29 = vadd.f32 %v1724_v12, %v2717_v49 }
 0x518   :  { %v1726_v40 = vpop.f32.mrf.mxu1 }
 0x519   :  { %1637 = vst [vmem:[%s2790_s7 + $0x70] sm:$0xff] %v1615_v29  ;;  %v1727_v22 = vadd.f32 %v1726_v40, %v1725_v21 }
 0x51b   :  { %v1620_v24 = vadd.f32 %v1727_v22, %v2717_v49 }
 0x51d   :  { %1638 = vst [vmem:[%s2790_s7 + $0x78] sm:$0xff] %v1620_v24 }
 0x51e   :  { %1643 = vsyncpa [#allocation3], 1 }

</bundles_post_ra>
